<compile_context>
chip_gen: v7x
topology: tpu7x:2x2x1
jax: 0.10.0
libtpu: 0.0.40
codegen_flags: <defaults>
</compile_context>

<pallas_src>
import functools

import jax
import jax.numpy as jnp
from jax.experimental import pallas as pl
from jax.experimental.pallas import tpu as pltpu


# ---------------------------------------------------------------------------
# Fused kernel: conv1 -> ResidualBlock(conv1..conv4) -> conv2 -> ReLU
# ---------------------------------------------------------------------------
def _sequence_kernel(x_ref, bc1_ref, bands_ref, bias_ref, o_ref,
                     xin, buf_a, buf_b, *, nb, H, W, Cin, Cout):
    """`nb` batch elements per grid step, each staged into its own (H+2)-row slot.

    xin   : VMEM (nb*(H+2), W*Cin)  f32  -- input slab with zero halo rows
    buf_a : VMEM (nb*(H+2), W*Cout) f32  -- ping
    buf_b : VMEM (nb*(H+2), W*Cout) f32  -- pong
    """
    WCi, WCo = W * Cin, W * Cout
    S = H + 2                     # slot height: [top halo, H interior rows, bottom halo]
    M = nb * S - 2                # matmul rows; acc row r corresponds to slab row r + 1

    # ---- zero every slot's two halo rows once per invocation (scratch is
    #      uninitialised; interiors are fully rewritten below, halos never are) ----
    zi = jnp.zeros((1, WCi), xin.dtype)
    zo = jnp.zeros((1, WCo), buf_a.dtype)
    for b in range(nb):
        t, m = b * S, b * S + H + 1
        xin[t:t + 1, :] = zi
        xin[m:m + 1, :] = zi
        buf_a[t:t + 1, :] = zo
        buf_a[m:m + 1, :] = zo
        buf_b[t:t + 1, :] = zo
        buf_b[m:m + 1, :] = zo

    def stage(dst, val):
        # Write only the interior rows of each slot; halos stay zero.
        for b in range(nb):
            base = b * S
            dst[base + 1:base + 1 + H, :] = val[base:base + H, :]

    def conv(src, band, j, relu):
        # out[r] = bias[j] + sum_dh src[r+dh] @ band[dh]
        # (3 bf16 MXU matmuls over the whole stacked slab, f32 accumulation)
        acc = jnp.broadcast_to(bias_ref[j:j + 1, :], (M, WCo)).astype(jnp.float32)
        for dh in range(3):
            acc = acc + jnp.dot(src[dh:dh + M, :].astype(jnp.bfloat16), band[dh],
                                preferred_element_type=jnp.float32)
        if relu:
            acc = jnp.maximum(acc, 0.0)
        return acc                                    # (M, W*Cout), lane-dense, f32

    # Stage the lane-dense input into its slots.
    for b in range(nb):
        base = b * S
        xin[base + 1:base + 1 + H, :] = x_ref[b].astype(jnp.float32)

    a0 = conv(xin, bc1_ref, 0, relu=False)            # Sequence.conv1
    stage(buf_a, a0)
    a1 = conv(buf_a, bands_ref.at[0], 1, relu=True)   # Res.conv1 + ReLU
    stage(buf_b, a1)
    a2 = conv(buf_b, bands_ref.at[1], 2, relu=True)   # Res.conv2 + ReLU  (= x1)
    stage(buf_a, a2)
    a3 = conv(buf_a, bands_ref.at[2], 3, relu=True)   # Res.conv3 + ReLU
    stage(buf_b, a3)
    a4 = conv(buf_b, bands_ref.at[3], 4, relu=True)   # Res.conv4 + ReLU  (= y)
    ret = a0 + a2 + a4                                # x + x1 + y, fused in f32 vregs
    stage(buf_a, ret)
    out = conv(buf_a, bands_ref.at[4], 5, relu=True)  # Sequence.conv2 + ReLU
    for b in range(nb):
        o_ref[b] = out[b * S:b * S + H, :].astype(o_ref.dtype)   # 128-lane dense store


# ---------------------------------------------------------------------------
# Wrapper: weight expansion + pallas_call
# ---------------------------------------------------------------------------
def _make_band(w, W):
    """HWIO (3,3,Cin,Cout) -> (3, W*Cin, W*Cout) block-banded matmul weights.

    B[dh][j*Cin+ci, wo*Cout+co] = w[dh, j-wo+1, ci, co]  if 0 <= j-wo+1 <= 2 else 0,
    implementing the horizontal SAME (pad=1) convolution as one matmul per dh.
    """
    # TODO(synk): O((W*C)^2) and mostly structural zeros; K-tile the band (W-column
    # strips) or switch to a pltpu.roll + dense (Cin,Cout) formulation before scaling
    # the image size (v7x has only 64 MiB VMEM per TensorCore).
    kh, kw, Cin, Cout = w.shape
    bands = []
    for dh in range(kh):
        B = jnp.zeros((W * Cin, W * Cout), jnp.float32)
        for dw in range(kw):
            eye = jnp.eye(W, k=1 - dw, dtype=jnp.float32)
            B = B + jnp.kron(eye, w[dh, dw].astype(jnp.float32))
        bands.append(B)
    return jnp.stack(bands)


def sequence_forward(x_nhwc, params, *, block_batch=8):
    """Pallas implementation of Sequence.forward (NHWC activations)."""
    N, H, W, Cin = x_nhwc.shape
    Cout = params["c1_w"].shape[-1]
    WCi, WCo = W * Cin, W * Cout
    names = ("c1", "r1", "r2", "r3", "r4", "c2")

    # Batch elements per grid step.  Keep >= 2 grid steps when possible so the
    # "parallel" batch axis can still shard across both TensorCores on v7x.
    nb = max(1, min(block_batch, N))
    if N >= 2:
        nb = min(nb, N // 2)
    while N % nb:
        nb -= 1

    x_flat = x_nhwc.reshape(N, H, WCi)                                # lane-dense rows

    band_c1 = _make_band(params["c1_w"], W).astype(jnp.bfloat16)      # (3, WCi, WCo)
    bands = jnp.stack([_make_band(params[f"{n}_w"], W)
                       for n in names[1:]]).astype(jnp.bfloat16)      # (5, 3, WCo, WCo)
    biases = jnp.stack([jnp.tile(params[f"{n}_b"].astype(jnp.float32), W)
                        for n in names])                              # (6, WCo) f32

    kernel = functools.partial(_sequence_kernel, nb=nb, H=H, W=W, Cin=Cin, Cout=Cout)

    out_flat = pl.pallas_call(
        kernel,
        out_shape=jax.ShapeDtypeStruct((N, H, WCo), x_nhwc.dtype),
        grid_spec=pltpu.PrefetchScalarGridSpec(
            num_scalar_prefetch=0,
            grid=(N // nb,),
            in_specs=[
                pl.BlockSpec((nb, H, WCi), lambda n: (n, 0, 0)),
                pl.BlockSpec((3, WCi, WCo), lambda n: (0, 0, 0)),
                pl.BlockSpec((5, 3, WCo, WCo), lambda n: (0, 0, 0, 0)),
                pl.BlockSpec((6, WCo), lambda n: (0, 0)),
            ],
            out_specs=pl.BlockSpec((nb, H, WCo), lambda n: (n, 0, 0)),
            scratch_shapes=[pltpu.VMEM((nb * (H + 2), WCi), jnp.float32),
                            pltpu.VMEM((nb * (H + 2), WCo), jnp.float32),
                            pltpu.VMEM((nb * (H + 2), WCo), jnp.float32)],
        ),
        compiler_params=pltpu.CompilerParams(
            dimension_semantics=("parallel",)),
    )(x_flat, band_c1, bands, biases)

    return out_flat.reshape(N, H, W, Cout)


def init_params(key, in_channels, out_channels):
    """Deterministic synthetic parameters (shapes match the PyTorch module)."""
    names_cin = [
        ("c1", in_channels),   # Sequence.conv1
        ("r1", out_channels),  # ResidualBlock.conv1
        ("r2", out_channels),  # ResidualBlock.conv2
        ("r3", out_channels),  # ResidualBlock.conv3
        ("r4", out_channels),  # ResidualBlock.conv4
        ("c2", out_channels),  # Sequence.conv2
    ]
    params = {}
    for name, cin in names_cin:
        key, kw, kb = jax.random.split(key, 3)
        params[f"{name}_w"] = 0.1 * jax.random.normal(
            kw, (3, 3, cin, out_channels), jnp.float32)
        params[f"{name}_b"] = 0.1 * jax.random.normal(
            kb, (out_channels,), jnp.float32)
    return params


# ---------------------------------------------------------------------------
# Pure-JAX reference (correctness check only)
# ---------------------------------------------------------------------------
def _conv_ref(x, w, b, relu=False, residuals=()):
    y = jax.lax.conv_general_dilated(
        x, w, window_strides=(1, 1), padding="SAME",
        dimension_numbers=("NHWC", "HWIO", "NHWC"))
    y = y + b.reshape(1, 1, 1, -1)
    if relu:
        y = jnp.maximum(y, 0.0)
    for r in residuals:
        y = y + r
    return y


def sequence_ref(x_nhwc, p):
    t0 = _conv_ref(x_nhwc, p["c1_w"], p["c1_b"])
    t1 = _conv_ref(t0, p["r1_w"], p["r1_b"], relu=True)
    t2 = _conv_ref(t1, p["r2_w"], p["r2_b"], relu=True)
    t3 = _conv_ref(t2, p["r3_w"], p["r3_b"], relu=True)
    t4 = _conv_ref(t3, p["r4_w"], p["r4_b"], relu=True, residuals=(t0, t2))
    return _conv_ref(t4, p["c2_w"], p["c2_b"], relu=True)


if __name__ == "__main__":
    key = jax.random.PRNGKey(0)
    k_x, k_p = jax.random.split(key)

    batch, in_channels, out_channels, H, W = 2, 4, 8, 16, 16

    # PyTorch-style NCHW input, transposed to NHWC for the kernel.
    x_nchw = jax.random.normal(k_x, (batch, in_channels, H, W), jnp.float32)
    x_nhwc = jnp.transpose(x_nchw, (0, 2, 3, 1))

    params = init_params(k_p, in_channels, out_channels)

    fwd = jax.jit(sequence_forward)
    out = jax.block_until_ready(fwd(x_nhwc, params))

    ref = sequence_ref(x_nhwc, params)
    assert out.shape == (batch, H, W, out_channels)
    # bf16 MXU operands -> loosened tolerance vs. the f32 XLA reference.
    assert jnp.allclose(out, ref, atol=5e-2, rtol=5e-2), "mismatch vs JAX reference"

    print("KERNEL_OK")
</pallas_src>

<mosaic_0001>
module attributes {stable_mosaic.version = 11 : i64} {
  func.func @_sequence_kernel(%arg0: i32, %arg1: memref<1x16x64xf32, #tpu.memory_space<vmem>>, %arg2: memref<3x64x128xbf16, #tpu.memory_space<vmem>>, %arg3: memref<5x3x128x128xbf16, #tpu.memory_space<vmem>>, %arg4: memref<6x128xf32, #tpu.memory_space<vmem>>, %arg5: memref<1x16x128xf32, #tpu.memory_space<vmem>>, %arg6: memref<18x64xf32, #tpu.memory_space<vmem>>, %arg7: memref<18x128xf32, #tpu.memory_space<vmem>>, %arg8: memref<18x128xf32, #tpu.memory_space<vmem>>) attributes {dimension_semantics = [#tpu.dimension_semantics<parallel>], iteration_bounds = array<i64: 2>, scalar_prefetch = 0 : i64, scratch_operands = 3 : i64, tpu.core_type = #tpu.core_type<tc>, window_params = [{transform_indices = @transform_0, window_bounds = array<i64: 1, 16, 64>}, {pipeline_mode = #tpu.pipeline_mode<synchronous>, transform_indices = @transform_1, window_bounds = array<i64: 3, 64, 128>}, {pipeline_mode = #tpu.pipeline_mode<synchronous>, transform_indices = @transform_2, window_bounds = array<i64: 5, 3, 128, 128>}, {pipeline_mode = #tpu.pipeline_mode<synchronous>, transform_indices = @transform_3, window_bounds = array<i64: 6, 128>}, {transform_indices = @transform_4, window_bounds = array<i64: 1, 16, 128>}]} {
    %cst = arith.constant 0.000000e+00 : f32
    %0 = vector.broadcast %cst : f32 to vector<1x64xf32>
    %cst_0 = arith.constant 0.000000e+00 : f32
    %1 = vector.broadcast %cst_0 : f32 to vector<1x128xf32>
    %c0 = arith.constant 0 : index
    %c0_1 = arith.constant 0 : index
    %2 = vector.load %arg6[%c0, %c0_1] : memref<18x64xf32, #tpu.memory_space<vmem>>, vector<1x64xf32>
    tpu.vector_store %arg6[%c0, %c0_1], %0 {strides = array<i32>} : memref<18x64xf32, #tpu.memory_space<vmem>>, vector<1x64xf32>,
    %c17 = arith.constant 17 : index
    %c0_2 = arith.constant 0 : index
    %3 = vector.load %arg6[%c17, %c0_2] : memref<18x64xf32, #tpu.memory_space<vmem>>, vector<1x64xf32>
    tpu.vector_store %arg6[%c17, %c0_2], %0 {strides = array<i32>} : memref<18x64xf32, #tpu.memory_space<vmem>>, vector<1x64xf32>,
    %c0_3 = arith.constant 0 : index
    %c0_4 = arith.constant 0 : index
    %4 = vector.load %arg7[%c0_3, %c0_4] : memref<18x128xf32, #tpu.memory_space<vmem>>, vector<1x128xf32>
    tpu.vector_store %arg7[%c0_3, %c0_4], %1 {strides = array<i32>} : memref<18x128xf32, #tpu.memory_space<vmem>>, vector<1x128xf32>,
    %c17_5 = arith.constant 17 : index
    %c0_6 = arith.constant 0 : index
    %5 = vector.load %arg7[%c17_5, %c0_6] : memref<18x128xf32, #tpu.memory_space<vmem>>, vector<1x128xf32>
    tpu.vector_store %arg7[%c17_5, %c0_6], %1 {strides = array<i32>} : memref<18x128xf32, #tpu.memory_space<vmem>>, vector<1x128xf32>,
    %c0_7 = arith.constant 0 : index
    %c0_8 = arith.constant 0 : index
    %6 = vector.load %arg8[%c0_7, %c0_8] : memref<18x128xf32, #tpu.memory_space<vmem>>, vector<1x128xf32>
    tpu.vector_store %arg8[%c0_7, %c0_8], %1 {strides = array<i32>} : memref<18x128xf32, #tpu.memory_space<vmem>>, vector<1x128xf32>,
    %c17_9 = arith.constant 17 : index
    %c0_10 = arith.constant 0 : index
    %7 = vector.load %arg8[%c17_9, %c0_10] : memref<18x128xf32, #tpu.memory_space<vmem>>, vector<1x128xf32>
    tpu.vector_store %arg8[%c17_9, %c0_10], %1 {strides = array<i32>} : memref<18x128xf32, #tpu.memory_space<vmem>>, vector<1x128xf32>,
    %c0_11 = arith.constant 0 : index
    %c0_12 = arith.constant 0 : index
    %c0_13 = arith.constant 0 : index
    %8 = vector.load %arg1[%c0_11, %c0_12, %c0_13] : memref<1x16x64xf32, #tpu.memory_space<vmem>>, vector<1x16x64xf32>
    %9 = vector.shape_cast %8 : vector<1x16x64xf32> to vector<16x64xf32>
    %c1 = arith.constant 1 : index
    %c0_14 = arith.constant 0 : index
    %10 = vector.load %arg6[%c1, %c0_14] : memref<18x64xf32, #tpu.memory_space<vmem>>, vector<16x64xf32>
    tpu.vector_store %arg6[%c1, %c0_14], %9 {strides = array<i32>} : memref<18x64xf32, #tpu.memory_space<vmem>>, vector<16x64xf32>,
    %c0_15 = arith.constant 0 : index
    %c0_16 = arith.constant 0 : index
    %11 = vector.load %arg4[%c0_15, %c0_16] : memref<6x128xf32, #tpu.memory_space<vmem>>, vector<1x128xf32>
    %12 = vector.shape_cast %11 : vector<1x128xf32> to vector<1x128xf32>
    %13 = vector.broadcast %12 : vector<1x128xf32> to vector<16x128xf32>
    %c0_17 = arith.constant 0 : index
    %c0_18 = arith.constant 0 : index
    %14 = vector.load %arg6[%c0_17, %c0_18] : memref<18x64xf32, #tpu.memory_space<vmem>>, vector<16x64xf32>
    %15 = arith.truncf %14 : vector<16x64xf32> to vector<16x64xbf16>
    %c0_19 = arith.constant 0 : index
    %c0_20 = arith.constant 0 : index
    %c0_21 = arith.constant 0 : index
    %16 = vector.load %arg2[%c0_19, %c0_20, %c0_21] : memref<3x64x128xbf16, #tpu.memory_space<vmem>>, vector<1x64x128xbf16>
    %17 = vector.shape_cast %16 : vector<1x64x128xbf16> to vector<64x128xbf16>
    %cst_22 = arith.constant dense<0.000000e+00> : vector<16x128xf32>
    %18 = tpu.matmul %15, %17, %cst_22 {dimension_numbers = #tpu.dot_dimension_numbers<[1], [0], [0], [1], [0, 0, 1, 1], [], []>} : vector<16x64xbf16>, vector<64x128xbf16>, vector<16x128xf32> -> vector<16x128xf32>
    %19 = arith.addf %13, %18 : vector<16x128xf32>
    %c1_23 = arith.constant 1 : index
    %c0_24 = arith.constant 0 : index
    %20 = vector.load %arg6[%c1_23, %c0_24] : memref<18x64xf32, #tpu.memory_space<vmem>>, vector<16x64xf32>
    %21 = arith.truncf %20 : vector<16x64xf32> to vector<16x64xbf16>
    %c1_25 = arith.constant 1 : index
    %c0_26 = arith.constant 0 : index
    %c0_27 = arith.constant 0 : index
    %22 = vector.load %arg2[%c1_25, %c0_26, %c0_27] : memref<3x64x128xbf16, #tpu.memory_space<vmem>>, vector<1x64x128xbf16>
    %23 = vector.shape_cast %22 : vector<1x64x128xbf16> to vector<64x128xbf16>
    %cst_28 = arith.constant dense<0.000000e+00> : vector<16x128xf32>
    %24 = tpu.matmul %21, %23, %cst_28 {dimension_numbers = #tpu.dot_dimension_numbers<[1], [0], [0], [1], [0, 0, 1, 1], [], []>} : vector<16x64xbf16>, vector<64x128xbf16>, vector<16x128xf32> -> vector<16x128xf32>
    %25 = arith.addf %19, %24 : vector<16x128xf32>
    %c2 = arith.constant 2 : index
    %c0_29 = arith.constant 0 : index
    %26 = vector.load %arg6[%c2, %c0_29] : memref<18x64xf32, #tpu.memory_space<vmem>>, vector<16x64xf32>
    %27 = arith.truncf %26 : vector<16x64xf32> to vector<16x64xbf16>
    %c2_30 = arith.constant 2 : index
    %c0_31 = arith.constant 0 : index
    %c0_32 = arith.constant 0 : index
    %28 = vector.load %arg2[%c2_30, %c0_31, %c0_32] : memref<3x64x128xbf16, #tpu.memory_space<vmem>>, vector<1x64x128xbf16>
    %29 = vector.shape_cast %28 : vector<1x64x128xbf16> to vector<64x128xbf16>
    %cst_33 = arith.constant dense<0.000000e+00> : vector<16x128xf32>
    %30 = tpu.matmul %27, %29, %cst_33 {dimension_numbers = #tpu.dot_dimension_numbers<[1], [0], [0], [1], [0, 0, 1, 1], [], []>} : vector<16x64xbf16>, vector<64x128xbf16>, vector<16x128xf32> -> vector<16x128xf32>
    %31 = arith.addf %25, %30 : vector<16x128xf32>
    %c1_34 = arith.constant 1 : index
    %c0_35 = arith.constant 0 : index
    %32 = vector.load %arg7[%c1_34, %c0_35] : memref<18x128xf32, #tpu.memory_space<vmem>>, vector<16x128xf32>
    tpu.vector_store %arg7[%c1_34, %c0_35], %31 {strides = array<i32>} : memref<18x128xf32, #tpu.memory_space<vmem>>, vector<16x128xf32>,
    %c1_36 = arith.constant 1 : index
    %c0_37 = arith.constant 0 : index
    %33 = vector.load %arg4[%c1_36, %c0_37] : memref<6x128xf32, #tpu.memory_space<vmem>>, vector<1x128xf32>
    %34 = vector.shape_cast %33 : vector<1x128xf32> to vector<1x128xf32>
    %35 = vector.broadcast %34 : vector<1x128xf32> to vector<16x128xf32>
    %c0_38 = arith.constant 0 : index
    %c0_39 = arith.constant 0 : index
    %36 = vector.load %arg7[%c0_38, %c0_39] : memref<18x128xf32, #tpu.memory_space<vmem>>, vector<16x128xf32>
    %37 = arith.truncf %36 : vector<16x128xf32> to vector<16x128xbf16>
    %c0_i32 = arith.constant 0 : i32
    %c0_i32_40 = arith.constant 0 : i32
    %c0_i32_41 = arith.constant 0 : i32
    %c0_i32_42 = arith.constant 0 : i32
    %38 = tpu.memref_slice %arg3[%c0_i32, %c0_i32_40, %c0_i32_41, %c0_i32_42] : memref<5x3x128x128xbf16, #tpu.memory_space<vmem>> -> memref<1x3x128x128xbf16, #tpu.memory_space<vmem>>
    %39 = tpu.memref_squeeze %38 : memref<1x3x128x128xbf16, #tpu.memory_space<vmem>> -> memref<3x128x128xbf16, #tpu.memory_space<vmem>>
    %c0_43 = arith.constant 0 : index
    %c0_44 = arith.constant 0 : index
    %c0_45 = arith.constant 0 : index
    %40 = vector.load %39[%c0_43, %c0_44, %c0_45] : memref<3x128x128xbf16, #tpu.memory_space<vmem>>, vector<1x128x128xbf16>
    %41 = vector.shape_cast %40 : vector<1x128x128xbf16> to vector<128x128xbf16>
    %cst_46 = arith.constant dense<0.000000e+00> : vector<16x128xf32>
    %42 = tpu.matmul %37, %41, %cst_46 {dimension_numbers = #tpu.dot_dimension_numbers<[1], [0], [0], [1], [0, 0, 1, 1], [], []>} : vector<16x128xbf16>, vector<128x128xbf16>, vector<16x128xf32> -> vector<16x128xf32>
    %43 = arith.addf %35, %42 : vector<16x128xf32>
    %c1_47 = arith.constant 1 : index
    %c0_48 = arith.constant 0 : index
    %44 = vector.load %arg7[%c1_47, %c0_48] : memref<18x128xf32, #tpu.memory_space<vmem>>, vector<16x128xf32>
    %45 = arith.truncf %44 : vector<16x128xf32> to vector<16x128xbf16>
    %c0_i32_49 = arith.constant 0 : i32
    %c0_i32_50 = arith.constant 0 : i32
    %c0_i32_51 = arith.constant 0 : i32
    %c0_i32_52 = arith.constant 0 : i32
    %46 = tpu.memref_slice %arg3[%c0_i32_49, %c0_i32_50, %c0_i32_51, %c0_i32_52] : memref<5x3x128x128xbf16, #tpu.memory_space<vmem>> -> memref<1x3x128x128xbf16, #tpu.memory_space<vmem>>
    %47 = tpu.memref_squeeze %46 : memref<1x3x128x128xbf16, #tpu.memory_space<vmem>> -> memref<3x128x128xbf16, #tpu.memory_space<vmem>>
    %c1_53 = arith.constant 1 : index
    %c0_54 = arith.constant 0 : index
    %c0_55 = arith.constant 0 : index
    %48 = vector.load %47[%c1_53, %c0_54, %c0_55] : memref<3x128x128xbf16, #tpu.memory_space<vmem>>, vector<1x128x128xbf16>
    %49 = vector.shape_cast %48 : vector<1x128x128xbf16> to vector<128x128xbf16>
    %cst_56 = arith.constant dense<0.000000e+00> : vector<16x128xf32>
    %50 = tpu.matmul %45, %49, %cst_56 {dimension_numbers = #tpu.dot_dimension_numbers<[1], [0], [0], [1], [0, 0, 1, 1], [], []>} : vector<16x128xbf16>, vector<128x128xbf16>, vector<16x128xf32> -> vector<16x128xf32>
    %51 = arith.addf %43, %50 : vector<16x128xf32>
    %c2_57 = arith.constant 2 : index
    %c0_58 = arith.constant 0 : index
    %52 = vector.load %arg7[%c2_57, %c0_58] : memref<18x128xf32, #tpu.memory_space<vmem>>, vector<16x128xf32>
    %53 = arith.truncf %52 : vector<16x128xf32> to vector<16x128xbf16>
    %c0_i32_59 = arith.constant 0 : i32
    %c0_i32_60 = arith.constant 0 : i32
    %c0_i32_61 = arith.constant 0 : i32
    %c0_i32_62 = arith.constant 0 : i32
    %54 = tpu.memref_slice %arg3[%c0_i32_59, %c0_i32_60, %c0_i32_61, %c0_i32_62] : memref<5x3x128x128xbf16, #tpu.memory_space<vmem>> -> memref<1x3x128x128xbf16, #tpu.memory_space<vmem>>
    %55 = tpu.memref_squeeze %54 : memref<1x3x128x128xbf16, #tpu.memory_space<vmem>> -> memref<3x128x128xbf16, #tpu.memory_space<vmem>>
    %c2_63 = arith.constant 2 : index
    %c0_64 = arith.constant 0 : index
    %c0_65 = arith.constant 0 : index
    %56 = vector.load %55[%c2_63, %c0_64, %c0_65] : memref<3x128x128xbf16, #tpu.memory_space<vmem>>, vector<1x128x128xbf16>
    %57 = vector.shape_cast %56 : vector<1x128x128xbf16> to vector<128x128xbf16>
    %cst_66 = arith.constant dense<0.000000e+00> : vector<16x128xf32>
    %58 = tpu.matmul %53, %57, %cst_66 {dimension_numbers = #tpu.dot_dimension_numbers<[1], [0], [0], [1], [0, 0, 1, 1], [], []>} : vector<16x128xbf16>, vector<128x128xbf16>, vector<16x128xf32> -> vector<16x128xf32>
    %59 = arith.addf %51, %58 : vector<16x128xf32>
    %cst_67 = arith.constant 0.000000e+00 : f32
    %60 = vector.broadcast %cst_67 : f32 to vector<16x128xf32>
    %61 = arith.maximumf %59, %60 : vector<16x128xf32>
    %c1_68 = arith.constant 1 : index
    %c0_69 = arith.constant 0 : index
    %62 = vector.load %arg8[%c1_68, %c0_69] : memref<18x128xf32, #tpu.memory_space<vmem>>, vector<16x128xf32>
    tpu.vector_store %arg8[%c1_68, %c0_69], %61 {strides = array<i32>} : memref<18x128xf32, #tpu.memory_space<vmem>>, vector<16x128xf32>,
    %c2_70 = arith.constant 2 : index
    %c0_71 = arith.constant 0 : index
    %63 = vector.load %arg4[%c2_70, %c0_71] : memref<6x128xf32, #tpu.memory_space<vmem>>, vector<1x128xf32>
    %64 = vector.shape_cast %63 : vector<1x128xf32> to vector<1x128xf32>
    %65 = vector.broadcast %64 : vector<1x128xf32> to vector<16x128xf32>
    %c0_72 = arith.constant 0 : index
    %c0_73 = arith.constant 0 : index
    %66 = vector.load %arg8[%c0_72, %c0_73] : memref<18x128xf32, #tpu.memory_space<vmem>>, vector<16x128xf32>
    %67 = arith.truncf %66 : vector<16x128xf32> to vector<16x128xbf16>
    %c1_i32 = arith.constant 1 : i32
    %c0_i32_74 = arith.constant 0 : i32
    %c0_i32_75 = arith.constant 0 : i32
    %c0_i32_76 = arith.constant 0 : i32
    %68 = tpu.memref_slice %arg3[%c1_i32, %c0_i32_74, %c0_i32_75, %c0_i32_76] : memref<5x3x128x128xbf16, #tpu.memory_space<vmem>> -> memref<1x3x128x128xbf16, #tpu.memory_space<vmem>>
    %69 = tpu.memref_squeeze %68 : memref<1x3x128x128xbf16, #tpu.memory_space<vmem>> -> memref<3x128x128xbf16, #tpu.memory_space<vmem>>
    %c0_77 = arith.constant 0 : index
    %c0_78 = arith.constant 0 : index
    %c0_79 = arith.constant 0 : index
    %70 = vector.load %69[%c0_77, %c0_78, %c0_79] : memref<3x128x128xbf16, #tpu.memory_space<vmem>>, vector<1x128x128xbf16>
    %71 = vector.shape_cast %70 : vector<1x128x128xbf16> to vector<128x128xbf16>
    %cst_80 = arith.constant dense<0.000000e+00> : vector<16x128xf32>
    %72 = tpu.matmul %67, %71, %cst_80 {dimension_numbers = #tpu.dot_dimension_numbers<[1], [0], [0], [1], [0, 0, 1, 1], [], []>} : vector<16x128xbf16>, vector<128x128xbf16>, vector<16x128xf32> -> vector<16x128xf32>
    %73 = arith.addf %65, %72 : vector<16x128xf32>
    %c1_81 = arith.constant 1 : index
    %c0_82 = arith.constant 0 : index
    %74 = vector.load %arg8[%c1_81, %c0_82] : memref<18x128xf32, #tpu.memory_space<vmem>>, vector<16x128xf32>
    %75 = arith.truncf %74 : vector<16x128xf32> to vector<16x128xbf16>
    %c1_i32_83 = arith.constant 1 : i32
    %c0_i32_84 = arith.constant 0 : i32
    %c0_i32_85 = arith.constant 0 : i32
    %c0_i32_86 = arith.constant 0 : i32
    %76 = tpu.memref_slice %arg3[%c1_i32_83, %c0_i32_84, %c0_i32_85, %c0_i32_86] : memref<5x3x128x128xbf16, #tpu.memory_space<vmem>> -> memref<1x3x128x128xbf16, #tpu.memory_space<vmem>>
    %77 = tpu.memref_squeeze %76 : memref<1x3x128x128xbf16, #tpu.memory_space<vmem>> -> memref<3x128x128xbf16, #tpu.memory_space<vmem>>
    %c1_87 = arith.constant 1 : index
    %c0_88 = arith.constant 0 : index
    %c0_89 = arith.constant 0 : index
    %78 = vector.load %77[%c1_87, %c0_88, %c0_89] : memref<3x128x128xbf16, #tpu.memory_space<vmem>>, vector<1x128x128xbf16>
    %79 = vector.shape_cast %78 : vector<1x128x128xbf16> to vector<128x128xbf16>
    %cst_90 = arith.constant dense<0.000000e+00> : vector<16x128xf32>
    %80 = tpu.matmul %75, %79, %cst_90 {dimension_numbers = #tpu.dot_dimension_numbers<[1], [0], [0], [1], [0, 0, 1, 1], [], []>} : vector<16x128xbf16>, vector<128x128xbf16>, vector<16x128xf32> -> vector<16x128xf32>
    %81 = arith.addf %73, %80 : vector<16x128xf32>
    %c2_91 = arith.constant 2 : index
    %c0_92 = arith.constant 0 : index
    %82 = vector.load %arg8[%c2_91, %c0_92] : memref<18x128xf32, #tpu.memory_space<vmem>>, vector<16x128xf32>
    %83 = arith.truncf %82 : vector<16x128xf32> to vector<16x128xbf16>
    %c1_i32_93 = arith.constant 1 : i32
    %c0_i32_94 = arith.constant 0 : i32
    %c0_i32_95 = arith.constant 0 : i32
    %c0_i32_96 = arith.constant 0 : i32
    %84 = tpu.memref_slice %arg3[%c1_i32_93, %c0_i32_94, %c0_i32_95, %c0_i32_96] : memref<5x3x128x128xbf16, #tpu.memory_space<vmem>> -> memref<1x3x128x128xbf16, #tpu.memory_space<vmem>>
    %85 = tpu.memref_squeeze %84 : memref<1x3x128x128xbf16, #tpu.memory_space<vmem>> -> memref<3x128x128xbf16, #tpu.memory_space<vmem>>
    %c2_97 = arith.constant 2 : index
    %c0_98 = arith.constant 0 : index
    %c0_99 = arith.constant 0 : index
    %86 = vector.load %85[%c2_97, %c0_98, %c0_99] : memref<3x128x128xbf16, #tpu.memory_space<vmem>>, vector<1x128x128xbf16>
    %87 = vector.shape_cast %86 : vector<1x128x128xbf16> to vector<128x128xbf16>
    %cst_100 = arith.constant dense<0.000000e+00> : vector<16x128xf32>
    %88 = tpu.matmul %83, %87, %cst_100 {dimension_numbers = #tpu.dot_dimension_numbers<[1], [0], [0], [1], [0, 0, 1, 1], [], []>} : vector<16x128xbf16>, vector<128x128xbf16>, vector<16x128xf32> -> vector<16x128xf32>
    %89 = arith.addf %81, %88 : vector<16x128xf32>
    %cst_101 = arith.constant 0.000000e+00 : f32
    %90 = vector.broadcast %cst_101 : f32 to vector<16x128xf32>
    %91 = arith.maximumf %89, %90 : vector<16x128xf32>
    %c1_102 = arith.constant 1 : index
    %c0_103 = arith.constant 0 : index
    %92 = vector.load %arg7[%c1_102, %c0_103] : memref<18x128xf32, #tpu.memory_space<vmem>>, vector<16x128xf32>
    tpu.vector_store %arg7[%c1_102, %c0_103], %91 {strides = array<i32>} : memref<18x128xf32, #tpu.memory_space<vmem>>, vector<16x128xf32>,
    %c3 = arith.constant 3 : index
    %c0_104 = arith.constant 0 : index
    %93 = vector.load %arg4[%c3, %c0_104] : memref<6x128xf32, #tpu.memory_space<vmem>>, vector<1x128xf32>
    %94 = vector.shape_cast %93 : vector<1x128xf32> to vector<1x128xf32>
    %95 = vector.broadcast %94 : vector<1x128xf32> to vector<16x128xf32>
    %c0_105 = arith.constant 0 : index
    %c0_106 = arith.constant 0 : index
    %96 = vector.load %arg7[%c0_105, %c0_106] : memref<18x128xf32, #tpu.memory_space<vmem>>, vector<16x128xf32>
    %97 = arith.truncf %96 : vector<16x128xf32> to vector<16x128xbf16>
    %c2_i32 = arith.constant 2 : i32
    %c0_i32_107 = arith.constant 0 : i32
    %c0_i32_108 = arith.constant 0 : i32
    %c0_i32_109 = arith.constant 0 : i32
    %98 = tpu.memref_slice %arg3[%c2_i32, %c0_i32_107, %c0_i32_108, %c0_i32_109] : memref<5x3x128x128xbf16, #tpu.memory_space<vmem>> -> memref<1x3x128x128xbf16, #tpu.memory_space<vmem>>
    %99 = tpu.memref_squeeze %98 : memref<1x3x128x128xbf16, #tpu.memory_space<vmem>> -> memref<3x128x128xbf16, #tpu.memory_space<vmem>>
    %c0_110 = arith.constant 0 : index
    %c0_111 = arith.constant 0 : index
    %c0_112 = arith.constant 0 : index
    %100 = vector.load %99[%c0_110, %c0_111, %c0_112] : memref<3x128x128xbf16, #tpu.memory_space<vmem>>, vector<1x128x128xbf16>
    %101 = vector.shape_cast %100 : vector<1x128x128xbf16> to vector<128x128xbf16>
    %cst_113 = arith.constant dense<0.000000e+00> : vector<16x128xf32>
    %102 = tpu.matmul %97, %101, %cst_113 {dimension_numbers = #tpu.dot_dimension_numbers<[1], [0], [0], [1], [0, 0, 1, 1], [], []>} : vector<16x128xbf16>, vector<128x128xbf16>, vector<16x128xf32> -> vector<16x128xf32>
    %103 = arith.addf %95, %102 : vector<16x128xf32>
    %c1_114 = arith.constant 1 : index
    %c0_115 = arith.constant 0 : index
    %104 = vector.load %arg7[%c1_114, %c0_115] : memref<18x128xf32, #tpu.memory_space<vmem>>, vector<16x128xf32>
    %105 = arith.truncf %104 : vector<16x128xf32> to vector<16x128xbf16>
    %c2_i32_116 = arith.constant 2 : i32
    %c0_i32_117 = arith.constant 0 : i32
    %c0_i32_118 = arith.constant 0 : i32
    %c0_i32_119 = arith.constant 0 : i32
    %106 = tpu.memref_slice %arg3[%c2_i32_116, %c0_i32_117, %c0_i32_118, %c0_i32_119] : memref<5x3x128x128xbf16, #tpu.memory_space<vmem>> -> memref<1x3x128x128xbf16, #tpu.memory_space<vmem>>
    %107 = tpu.memref_squeeze %106 : memref<1x3x128x128xbf16, #tpu.memory_space<vmem>> -> memref<3x128x128xbf16, #tpu.memory_space<vmem>>
    %c1_120 = arith.constant 1 : index
    %c0_121 = arith.constant 0 : index
    %c0_122 = arith.constant 0 : index
    %108 = vector.load %107[%c1_120, %c0_121, %c0_122] : memref<3x128x128xbf16, #tpu.memory_space<vmem>>, vector<1x128x128xbf16>
    %109 = vector.shape_cast %108 : vector<1x128x128xbf16> to vector<128x128xbf16>
    %cst_123 = arith.constant dense<0.000000e+00> : vector<16x128xf32>
    %110 = tpu.matmul %105, %109, %cst_123 {dimension_numbers = #tpu.dot_dimension_numbers<[1], [0], [0], [1], [0, 0, 1, 1], [], []>} : vector<16x128xbf16>, vector<128x128xbf16>, vector<16x128xf32> -> vector<16x128xf32>
    %111 = arith.addf %103, %110 : vector<16x128xf32>
    %c2_124 = arith.constant 2 : index
    %c0_125 = arith.constant 0 : index
    %112 = vector.load %arg7[%c2_124, %c0_125] : memref<18x128xf32, #tpu.memory_space<vmem>>, vector<16x128xf32>
    %113 = arith.truncf %112 : vector<16x128xf32> to vector<16x128xbf16>
    %c2_i32_126 = arith.constant 2 : i32
    %c0_i32_127 = arith.constant 0 : i32
    %c0_i32_128 = arith.constant 0 : i32
    %c0_i32_129 = arith.constant 0 : i32
    %114 = tpu.memref_slice %arg3[%c2_i32_126, %c0_i32_127, %c0_i32_128, %c0_i32_129] : memref<5x3x128x128xbf16, #tpu.memory_space<vmem>> -> memref<1x3x128x128xbf16, #tpu.memory_space<vmem>>
    %115 = tpu.memref_squeeze %114 : memref<1x3x128x128xbf16, #tpu.memory_space<vmem>> -> memref<3x128x128xbf16, #tpu.memory_space<vmem>>
    %c2_130 = arith.constant 2 : index
    %c0_131 = arith.constant 0 : index
    %c0_132 = arith.constant 0 : index
    %116 = vector.load %115[%c2_130, %c0_131, %c0_132] : memref<3x128x128xbf16, #tpu.memory_space<vmem>>, vector<1x128x128xbf16>
    %117 = vector.shape_cast %116 : vector<1x128x128xbf16> to vector<128x128xbf16>
    %cst_133 = arith.constant dense<0.000000e+00> : vector<16x128xf32>
    %118 = tpu.matmul %113, %117, %cst_133 {dimension_numbers = #tpu.dot_dimension_numbers<[1], [0], [0], [1], [0, 0, 1, 1], [], []>} : vector<16x128xbf16>, vector<128x128xbf16>, vector<16x128xf32> -> vector<16x128xf32>
    %119 = arith.addf %111, %118 : vector<16x128xf32>
    %cst_134 = arith.constant 0.000000e+00 : f32
    %120 = vector.broadcast %cst_134 : f32 to vector<16x128xf32>
    %121 = arith.maximumf %119, %120 : vector<16x128xf32>
    %c1_135 = arith.constant 1 : index
    %c0_136 = arith.constant 0 : index
    %122 = vector.load %arg8[%c1_135, %c0_136] : memref<18x128xf32, #tpu.memory_space<vmem>>, vector<16x128xf32>
    tpu.vector_store %arg8[%c1_135, %c0_136], %121 {strides = array<i32>} : memref<18x128xf32, #tpu.memory_space<vmem>>, vector<16x128xf32>,
    %c4 = arith.constant 4 : index
    %c0_137 = arith.constant 0 : index
    %123 = vector.load %arg4[%c4, %c0_137] : memref<6x128xf32, #tpu.memory_space<vmem>>, vector<1x128xf32>
    %124 = vector.shape_cast %123 : vector<1x128xf32> to vector<1x128xf32>
    %125 = vector.broadcast %124 : vector<1x128xf32> to vector<16x128xf32>
    %c0_138 = arith.constant 0 : index
    %c0_139 = arith.constant 0 : index
    %126 = vector.load %arg8[%c0_138, %c0_139] : memref<18x128xf32, #tpu.memory_space<vmem>>, vector<16x128xf32>
    %127 = arith.truncf %126 : vector<16x128xf32> to vector<16x128xbf16>
    %c3_i32 = arith.constant 3 : i32
    %c0_i32_140 = arith.constant 0 : i32
    %c0_i32_141 = arith.constant 0 : i32
    %c0_i32_142 = arith.constant 0 : i32
    %128 = tpu.memref_slice %arg3[%c3_i32, %c0_i32_140, %c0_i32_141, %c0_i32_142] : memref<5x3x128x128xbf16, #tpu.memory_space<vmem>> -> memref<1x3x128x128xbf16, #tpu.memory_space<vmem>>
    %129 = tpu.memref_squeeze %128 : memref<1x3x128x128xbf16, #tpu.memory_space<vmem>> -> memref<3x128x128xbf16, #tpu.memory_space<vmem>>
    %c0_143 = arith.constant 0 : index
    %c0_144 = arith.constant 0 : index
    %c0_145 = arith.constant 0 : index
    %130 = vector.load %129[%c0_143, %c0_144, %c0_145] : memref<3x128x128xbf16, #tpu.memory_space<vmem>>, vector<1x128x128xbf16>
    %131 = vector.shape_cast %130 : vector<1x128x128xbf16> to vector<128x128xbf16>
    %cst_146 = arith.constant dense<0.000000e+00> : vector<16x128xf32>
    %132 = tpu.matmul %127, %131, %cst_146 {dimension_numbers = #tpu.dot_dimension_numbers<[1], [0], [0], [1], [0, 0, 1, 1], [], []>} : vector<16x128xbf16>, vector<128x128xbf16>, vector<16x128xf32> -> vector<16x128xf32>
    %133 = arith.addf %125, %132 : vector<16x128xf32>
    %c1_147 = arith.constant 1 : index
    %c0_148 = arith.constant 0 : index
    %134 = vector.load %arg8[%c1_147, %c0_148] : memref<18x128xf32, #tpu.memory_space<vmem>>, vector<16x128xf32>
    %135 = arith.truncf %134 : vector<16x128xf32> to vector<16x128xbf16>
    %c3_i32_149 = arith.constant 3 : i32
    %c0_i32_150 = arith.constant 0 : i32
    %c0_i32_151 = arith.constant 0 : i32
    %c0_i32_152 = arith.constant 0 : i32
    %136 = tpu.memref_slice %arg3[%c3_i32_149, %c0_i32_150, %c0_i32_151, %c0_i32_152] : memref<5x3x128x128xbf16, #tpu.memory_space<vmem>> -> memref<1x3x128x128xbf16, #tpu.memory_space<vmem>>
    %137 = tpu.memref_squeeze %136 : memref<1x3x128x128xbf16, #tpu.memory_space<vmem>> -> memref<3x128x128xbf16, #tpu.memory_space<vmem>>
    %c1_153 = arith.constant 1 : index
    %c0_154 = arith.constant 0 : index
    %c0_155 = arith.constant 0 : index
    %138 = vector.load %137[%c1_153, %c0_154, %c0_155] : memref<3x128x128xbf16, #tpu.memory_space<vmem>>, vector<1x128x128xbf16>
    %139 = vector.shape_cast %138 : vector<1x128x128xbf16> to vector<128x128xbf16>
    %cst_156 = arith.constant dense<0.000000e+00> : vector<16x128xf32>
    %140 = tpu.matmul %135, %139, %cst_156 {dimension_numbers = #tpu.dot_dimension_numbers<[1], [0], [0], [1], [0, 0, 1, 1], [], []>} : vector<16x128xbf16>, vector<128x128xbf16>, vector<16x128xf32> -> vector<16x128xf32>
    %141 = arith.addf %133, %140 : vector<16x128xf32>
    %c2_157 = arith.constant 2 : index
    %c0_158 = arith.constant 0 : index
    %142 = vector.load %arg8[%c2_157, %c0_158] : memref<18x128xf32, #tpu.memory_space<vmem>>, vector<16x128xf32>
    %143 = arith.truncf %142 : vector<16x128xf32> to vector<16x128xbf16>
    %c3_i32_159 = arith.constant 3 : i32
    %c0_i32_160 = arith.constant 0 : i32
    %c0_i32_161 = arith.constant 0 : i32
    %c0_i32_162 = arith.constant 0 : i32
    %144 = tpu.memref_slice %arg3[%c3_i32_159, %c0_i32_160, %c0_i32_161, %c0_i32_162] : memref<5x3x128x128xbf16, #tpu.memory_space<vmem>> -> memref<1x3x128x128xbf16, #tpu.memory_space<vmem>>
    %145 = tpu.memref_squeeze %144 : memref<1x3x128x128xbf16, #tpu.memory_space<vmem>> -> memref<3x128x128xbf16, #tpu.memory_space<vmem>>
    %c2_163 = arith.constant 2 : index
    %c0_164 = arith.constant 0 : index
    %c0_165 = arith.constant 0 : index
    %146 = vector.load %145[%c2_163, %c0_164, %c0_165] : memref<3x128x128xbf16, #tpu.memory_space<vmem>>, vector<1x128x128xbf16>
    %147 = vector.shape_cast %146 : vector<1x128x128xbf16> to vector<128x128xbf16>
    %cst_166 = arith.constant dense<0.000000e+00> : vector<16x128xf32>
    %148 = tpu.matmul %143, %147, %cst_166 {dimension_numbers = #tpu.dot_dimension_numbers<[1], [0], [0], [1], [0, 0, 1, 1], [], []>} : vector<16x128xbf16>, vector<128x128xbf16>, vector<16x128xf32> -> vector<16x128xf32>
    %149 = arith.addf %141, %148 : vector<16x128xf32>
    %cst_167 = arith.constant 0.000000e+00 : f32
    %150 = vector.broadcast %cst_167 : f32 to vector<16x128xf32>
    %151 = arith.maximumf %149, %150 : vector<16x128xf32>
    %152 = arith.addf %31, %91 : vector<16x128xf32>
    %153 = arith.addf %152, %151 : vector<16x128xf32>
    %c1_168 = arith.constant 1 : index
    %c0_169 = arith.constant 0 : index
    %154 = vector.load %arg7[%c1_168, %c0_169] : memref<18x128xf32, #tpu.memory_space<vmem>>, vector<16x128xf32>
    tpu.vector_store %arg7[%c1_168, %c0_169], %153 {strides = array<i32>} : memref<18x128xf32, #tpu.memory_space<vmem>>, vector<16x128xf32>,
    %c5 = arith.constant 5 : index
    %c0_170 = arith.constant 0 : index
    %155 = vector.load %arg4[%c5, %c0_170] : memref<6x128xf32, #tpu.memory_space<vmem>>, vector<1x128xf32>
    %156 = vector.shape_cast %155 : vector<1x128xf32> to vector<1x128xf32>
    %157 = vector.broadcast %156 : vector<1x128xf32> to vector<16x128xf32>
    %c0_171 = arith.constant 0 : index
    %c0_172 = arith.constant 0 : index
    %158 = vector.load %arg7[%c0_171, %c0_172] : memref<18x128xf32, #tpu.memory_space<vmem>>, vector<16x128xf32>
    %159 = arith.truncf %158 : vector<16x128xf32> to vector<16x128xbf16>
    %c4_i32 = arith.constant 4 : i32
    %c0_i32_173 = arith.constant 0 : i32
    %c0_i32_174 = arith.constant 0 : i32
    %c0_i32_175 = arith.constant 0 : i32
    %160 = tpu.memref_slice %arg3[%c4_i32, %c0_i32_173, %c0_i32_174, %c0_i32_175] : memref<5x3x128x128xbf16, #tpu.memory_space<vmem>> -> memref<1x3x128x128xbf16, #tpu.memory_space<vmem>>
    %161 = tpu.memref_squeeze %160 : memref<1x3x128x128xbf16, #tpu.memory_space<vmem>> -> memref<3x128x128xbf16, #tpu.memory_space<vmem>>
    %c0_176 = arith.constant 0 : index
    %c0_177 = arith.constant 0 : index
    %c0_178 = arith.constant 0 : index
    %162 = vector.load %161[%c0_176, %c0_177, %c0_178] : memref<3x128x128xbf16, #tpu.memory_space<vmem>>, vector<1x128x128xbf16>
    %163 = vector.shape_cast %162 : vector<1x128x128xbf16> to vector<128x128xbf16>
    %cst_179 = arith.constant dense<0.000000e+00> : vector<16x128xf32>
    %164 = tpu.matmul %159, %163, %cst_179 {dimension_numbers = #tpu.dot_dimension_numbers<[1], [0], [0], [1], [0, 0, 1, 1], [], []>} : vector<16x128xbf16>, vector<128x128xbf16>, vector<16x128xf32> -> vector<16x128xf32>
    %165 = arith.addf %157, %164 : vector<16x128xf32>
    %c1_180 = arith.constant 1 : index
    %c0_181 = arith.constant 0 : index
    %166 = vector.load %arg7[%c1_180, %c0_181] : memref<18x128xf32, #tpu.memory_space<vmem>>, vector<16x128xf32>
    %167 = arith.truncf %166 : vector<16x128xf32> to vector<16x128xbf16>
    %c4_i32_182 = arith.constant 4 : i32
    %c0_i32_183 = arith.constant 0 : i32
    %c0_i32_184 = arith.constant 0 : i32
    %c0_i32_185 = arith.constant 0 : i32
    %168 = tpu.memref_slice %arg3[%c4_i32_182, %c0_i32_183, %c0_i32_184, %c0_i32_185] : memref<5x3x128x128xbf16, #tpu.memory_space<vmem>> -> memref<1x3x128x128xbf16, #tpu.memory_space<vmem>>
    %169 = tpu.memref_squeeze %168 : memref<1x3x128x128xbf16, #tpu.memory_space<vmem>> -> memref<3x128x128xbf16, #tpu.memory_space<vmem>>
    %c1_186 = arith.constant 1 : index
    %c0_187 = arith.constant 0 : index
    %c0_188 = arith.constant 0 : index
    %170 = vector.load %169[%c1_186, %c0_187, %c0_188] : memref<3x128x128xbf16, #tpu.memory_space<vmem>>, vector<1x128x128xbf16>
    %171 = vector.shape_cast %170 : vector<1x128x128xbf16> to vector<128x128xbf16>
    %cst_189 = arith.constant dense<0.000000e+00> : vector<16x128xf32>
    %172 = tpu.matmul %167, %171, %cst_189 {dimension_numbers = #tpu.dot_dimension_numbers<[1], [0], [0], [1], [0, 0, 1, 1], [], []>} : vector<16x128xbf16>, vector<128x128xbf16>, vector<16x128xf32> -> vector<16x128xf32>
    %173 = arith.addf %165, %172 : vector<16x128xf32>
    %c2_190 = arith.constant 2 : index
    %c0_191 = arith.constant 0 : index
    %174 = vector.load %arg7[%c2_190, %c0_191] : memref<18x128xf32, #tpu.memory_space<vmem>>, vector<16x128xf32>
    %175 = arith.truncf %174 : vector<16x128xf32> to vector<16x128xbf16>
    %c4_i32_192 = arith.constant 4 : i32
    %c0_i32_193 = arith.constant 0 : i32
    %c0_i32_194 = arith.constant 0 : i32
    %c0_i32_195 = arith.constant 0 : i32
    %176 = tpu.memref_slice %arg3[%c4_i32_192, %c0_i32_193, %c0_i32_194, %c0_i32_195] : memref<5x3x128x128xbf16, #tpu.memory_space<vmem>> -> memref<1x3x128x128xbf16, #tpu.memory_space<vmem>>
    %177 = tpu.memref_squeeze %176 : memref<1x3x128x128xbf16, #tpu.memory_space<vmem>> -> memref<3x128x128xbf16, #tpu.memory_space<vmem>>
    %c2_196 = arith.constant 2 : index
    %c0_197 = arith.constant 0 : index
    %c0_198 = arith.constant 0 : index
    %178 = vector.load %177[%c2_196, %c0_197, %c0_198] : memref<3x128x128xbf16, #tpu.memory_space<vmem>>, vector<1x128x128xbf16>
    %179 = vector.shape_cast %178 : vector<1x128x128xbf16> to vector<128x128xbf16>
    %cst_199 = arith.constant dense<0.000000e+00> : vector<16x128xf32>
    %180 = tpu.matmul %175, %179, %cst_199 {dimension_numbers = #tpu.dot_dimension_numbers<[1], [0], [0], [1], [0, 0, 1, 1], [], []>} : vector<16x128xbf16>, vector<128x128xbf16>, vector<16x128xf32> -> vector<16x128xf32>
    %181 = arith.addf %173, %180 : vector<16x128xf32>
    %cst_200 = arith.constant 0.000000e+00 : f32
    %182 = vector.broadcast %cst_200 : f32 to vector<16x128xf32>
    %183 = arith.maximumf %181, %182 : vector<16x128xf32>
    %c0_201 = arith.constant 0 : index
    %c0_202 = arith.constant 0 : index
    %c0_203 = arith.constant 0 : index
    %184 = vector.load %arg5[%c0_201, %c0_202, %c0_203] : memref<1x16x128xf32, #tpu.memory_space<vmem>>, vector<1x16x128xf32>
    %185 = vector.shape_cast %184 : vector<1x16x128xf32> to vector<16x128xf32>
    %186 = vector.shape_cast %183 : vector<16x128xf32> to vector<1x16x128xf32>
    tpu.vector_store %arg5[%c0_201, %c0_202, %c0_203], %186 {strides = array<i32>} : memref<1x16x128xf32, #tpu.memory_space<vmem>>, vector<1x16x128xf32>,
    return
  }
  func.func @transform_0(%arg0: i32) -> (i32, i32, i32) {
    %c0_i32 = arith.constant 0 : i32
    %c0_i32_0 = arith.constant 0 : i32
    %c0_i32_1 = arith.constant 0 : i32
    return %arg0, %c0_i32, %c0_i32_0 : i32, i32, i32
  }
  func.func @transform_1(%arg0: i32) -> (i32, i32, i32) {
    %c0_i32 = arith.constant 0 : i32
    %c0_i32_0 = arith.constant 0 : i32
    %c0_i32_1 = arith.constant 0 : i32
    %c0_i32_2 = arith.constant 0 : i32
    return %c0_i32, %c0_i32_0, %c0_i32_1 : i32, i32, i32
  }
  func.func @transform_2(%arg0: i32) -> (i32, i32, i32, i32) {
    %c0_i32 = arith.constant 0 : i32
    %c0_i32_0 = arith.constant 0 : i32
    %c0_i32_1 = arith.constant 0 : i32
    %c0_i32_2 = arith.constant 0 : i32
    %c0_i32_3 = arith.constant 0 : i32
    return %c0_i32, %c0_i32_0, %c0_i32_1, %c0_i32_2 : i32, i32, i32, i32
  }
  func.func @transform_3(%arg0: i32) -> (i32, i32) {
    %c0_i32 = arith.constant 0 : i32
    %c0_i32_0 = arith.constant 0 : i32
    %c0_i32_1 = arith.constant 0 : i32
    return %c0_i32, %c0_i32_0 : i32, i32
  }
  func.func @transform_4(%arg0: i32) -> (i32, i32, i32) {
    %c0_i32 = arith.constant 0 : i32
    %c0_i32_0 = arith.constant 0 : i32
    %c0_i32_1 = arith.constant 0 : i32
    return %arg0, %c0_i32, %c0_i32_0 : i32, i32, i32
  }
}

</mosaic_0001>

<bundles_post_ra>
// kernel: tile.33
= control target key start
LH: loop header
LB: loop body
LE: loop exit
PB: predicated region body
PF: predicated region fallthrough
CT: control target
= control target key end

     0   :  { %s28_s0 = inlined_call_operand.vmem [shape: f32[8], index: 0, kind: input, shape index: {}]   ;;  %s29_s1 = inlined_call_operand.vmem [shape: f32[16,8], index: 1, kind: output, shape index: {}]  }
   0x1   :  { %v4_v0 = vld [vmem:[%s28_s0] ss:$0 sm:$0xff] }
   0x2   :  { %5 = vst [vmem:[%s29_s1] sm:$0xff] %v4_v0  ;;  %8 = vst [vmem:[%s29_s1 + $0x8] sm:$0xff] %v4_v0 }

// kernel: tile.54
= control target key start
LH: loop header
LB: loop body
LE: loop exit
PB: predicated region body
PF: predicated region fallthrough
CT: control target
= control target key end

     0   :  { %s131_s10 = smov 120   ;;  %s132_s11 = smov 104   ;;  %vm3_vm0 = vcmask 64512   ;;  %vm9_vm1 = vcmask 1048512   ;;  %vm15_vm2 = vcmask 982912   ;;  %vm21_vm3 = vcmask 917312   ;;  %s207_s0 = inlined_call_operand.vmem [shape: f32[16,8], index: 0, kind: input, shape index: {}]   ;;  %s208_s1 = inlined_call_operand.vmem [shape: f32[1,128], index: 1, kind: output, shape index: {}]  }
   0x1   :  { %v101_v0 = vld [vmem:[%s207_s0 + $0xf] sm:$0x1]   ;;  %v103_v1 = vld [vmem:[%s207_s0 + $0xd] sm:$0x1]   ;;  %v102_v2 = vld [vmem:[%s207_s0 + $0xe] sm:$0x1]  }
   0x2   :  { %7 = vrot.lane.b32.xlu0 %v101_v0, %s131_s10  ;;  %19 = vrot.lane.b32.xlu1 %v103_v1, %s132_s11  ;;  %v104_v3 = vld [vmem:[%s207_s0 + $0xc] sm:$0x1]   ;;  %s133_s16 = smov 112   ;;  %s134_s17 = smov 96   ;;  %v105_v4 = vld [vmem:[%s207_s0 + $0xb] sm:$0x1]  }
   0x3   :  { %v106_v5 = vld [vmem:[%s207_s0 + $0xa] sm:$0x1]   ;;  %v2_v6 = vld [vmem:[%s207_s0] sm:$0x1]   ;;  %s135_s24 = smov 88   ;;  %s136_s25 = smov 80  }
   0x4   :  { %4 = vst.msk [vmem:[#allocation0] sm:$0x1] %vm3_vm0, %v2_v6   ;;  %v107_v7 = vld [vmem:[%s207_s0 + $0x9] sm:$0x1]   ;;  %v108_v8 = vld [vmem:[%s207_s0 + $0x8] sm:$0x1]  }
   0x5   :  { %s137_s30 = smov 72   ;;  %s138_s2 = smov 64   ;;  %v109_v9 = vld [vmem:[%s207_s0 + $0x7] sm:$0x1]   ;;  %v110_v10 = vld [vmem:[%s207_s0 + $0x6] sm:$0x1]  }
   0x6   :  { %13 = vrot.lane.b32.xlu0 %v102_v2, %s133_s16  ;;  %25 = vrot.lane.b32.xlu1 %v104_v3, %s134_s17  ;;  %s139_s7 = smov 56   ;;  %s140_s8 = smov 48   ;;  %v111_v11 = vld [vmem:[%s207_s0 + $0x5] sm:$0x1]   ;;  %v112_v12 = vld [vmem:[%s207_s0 + $0x4] sm:$0x1]  }
   0x7   :  { %s141_s13 = smov 40   ;;  %s142_s14 = smov 32   ;;  %v113_v13 = vld [vmem:[%s207_s0 + $0x3] sm:$0x1]   ;;  %v114_v14 = vld [vmem:[%s207_s0 + $0x2] sm:$0x1]  }
   0x8   :  { %s143_s19 = smov 24   ;;  %s144_s20 = smov 16   ;;  %v115_v15 = vld [vmem:[%s207_s0 + $0x1] sm:$0x1]   ;;  %vm27_vm4 = vcmask 851712   ;;  %vm33_vm5 = vcmask 786112  }
   0x9   :  { %s145_s0 = smov 8   ;;  %vm39_vm6 = vcmask 720512   ;;  %vm45_vm7 = vcmask 654912   ;;  %vm51_vm8 = vcmask 589312   ;;  %vm57_vm9 = vcmask 523712  }
   0xa   :  { %31 = vrot.lane.b32.xlu0 %v105_v4, %s135_s24  ;;  %37 = vrot.lane.b32.xlu1 %v106_v5, %s136_s25  ;;  %vm63_vm10 = vcmask 458112   ;;  %vm69_vm11 = vcmask 392512   ;;  %vm75_vm12 = vcmask 326912   ;;  %vm81_vm13 = vcmask 261312  }
   0xb   :  { %vm87_vm14 = vcmask 195712   ;;  %vm93_vm15 = vcmask 130112  }
   0xe   :  { %43 = vrot.lane.b32.xlu0 %v107_v7, %s137_s30  ;;  %49 = vrot.lane.b32.xlu1 %v108_v8, %s138_s2 }
  0x12   :  { %55 = vrot.lane.b32.xlu0 %v109_v9, %s139_s7  ;;  %61 = vrot.lane.b32.xlu1 %v110_v10, %s140_s8 }
  0x16   :  { %67 = vrot.lane.b32.xlu0 %v111_v11, %s141_s13  ;;  %73 = vrot.lane.b32.xlu1 %v112_v12, %s142_s14 }
  0x1a   :  { %79 = vrot.lane.b32.xlu0 %v113_v13, %s143_s19  ;;  %85 = vrot.lane.b32.xlu1 %v114_v14, %s144_s20 }
  0x1e   :  { %91 = vrot.lane.b32.xlu0 %v115_v15, %s145_s0 }
  0x74   :  { %v8_v16 = vpop.permute.xlu0 %7   ;;  %v20_v17 = vpop.permute.xlu1 %19  }
  0x75   :  { %10 = vst.msk [vmem:[#allocation0] sm:$0x1] %vm9_vm1, %v8_v16  }
  0x78   :  { %v14_v18 = vpop.permute.xlu0 %13   ;;  %v26_v19 = vpop.permute.xlu1 %25  }
  0x79   :  { %16 = vst.msk [vmem:[#allocation0] sm:$0x1] %vm15_vm2, %v14_v18  }
  0x7a   :  { %22 = vst.msk [vmem:[#allocation0] sm:$0x1] %vm21_vm3, %v20_v17  }
  0x7b   :  { %28 = vst.msk [vmem:[#allocation0] sm:$0x1] %vm27_vm4, %v26_v19  }
  0x7c   :  { %v32_v20 = vpop.permute.xlu0 %31   ;;  %v38_v21 = vpop.permute.xlu1 %37  }
  0x7d   :  { %34 = vst.msk [vmem:[#allocation0] sm:$0x1] %vm33_vm5, %v32_v20  }
  0x7e   :  { %40 = vst.msk [vmem:[#allocation0] sm:$0x1] %vm39_vm6, %v38_v21  }
  0x80   :  { %v44_v22 = vpop.permute.xlu0 %43   ;;  %v50_v23 = vpop.permute.xlu1 %49  }
  0x81   :  { %46 = vst.msk [vmem:[#allocation0] sm:$0x1] %vm45_vm7, %v44_v22  }
  0x82   :  { %52 = vst.msk [vmem:[#allocation0] sm:$0x1] %vm51_vm8, %v50_v23  }
  0x84   :  { %v56_v24 = vpop.permute.xlu0 %55   ;;  %v62_v25 = vpop.permute.xlu1 %61  }
  0x85   :  { %58 = vst.msk [vmem:[#allocation0] sm:$0x1] %vm57_vm9, %v56_v24  }
  0x86   :  { %64 = vst.msk [vmem:[#allocation0] sm:$0x1] %vm63_vm10, %v62_v25  }
  0x88   :  { %v68_v26 = vpop.permute.xlu0 %67   ;;  %v74_v27 = vpop.permute.xlu1 %73  }
  0x89   :  { %70 = vst.msk [vmem:[#allocation0] sm:$0x1] %vm69_vm11, %v68_v26  }
  0x8a   :  { %76 = vst.msk [vmem:[#allocation0] sm:$0x1] %vm75_vm12, %v74_v27  }
  0x8c   :  { %v80_v28 = vpop.permute.xlu0 %79   ;;  %v86_v29 = vpop.permute.xlu1 %85  }
  0x8d   :  { %82 = vst.msk [vmem:[#allocation0] sm:$0x1] %vm81_vm13, %v80_v28  }
  0x8e   :  { %88 = vst.msk [vmem:[#allocation0] sm:$0x1] %vm87_vm14, %v86_v29  }
  0x90   :  { %v92_v30 = vpop.permute.xlu0 %91  }
  0x91   :  { %94 = vst.msk [vmem:[#allocation0] sm:$0x1] %vm93_vm15, %v92_v30  }
  0x98   :  { %v98_v31 = vld [vmem:[#allocation0] sm:$0x1] }
  0x99   :  { %100 = vst [vmem:[%s208_s1] sm:$0x1] %v98_v31 }

// kernel: sequence_forward.1
= control target key start
LH: loop header
LB: loop body
LE: loop exit
PB: predicated region body
PF: predicated region fallthrough
CT: control target
= control target key end

     0   :  { %s3354_s15 = smov 0   ;;  %s3991_s0 = inlined_call_operand.vmem [shape: f32[2,16,64], index: 0, kind: input, shape index: {}]   ;;  %s3992_s1 = inlined_call_operand.vmem [shape: bf16[3,64,128], index: 1, kind: input, shape index: {}]   ;;  %s3993_s2 = inlined_call_operand.vmem [shape: bf16[5,3,128,128], index: 2, kind: input, shape index: {}]   ;;  %s3994_s3 = inlined_call_operand.vmem [shape: f32[6,128], index: 3, kind: input, shape index: {}]   ;;  %s3995_s4 = inlined_call_operand.vmem [shape: f32[2,16,128], index: 4, kind: output, shape index: {}]  }
   0x1 LB: > { %s2239_s16 = sadd.s32 4294967295, %s3325_s15   ;;  %p2243_p0 = scmp.ge.s32.totalorder %s3325_s15, 1  ;;  %s3325_s15 = sphi %s3354_s15, %s14_s15  }
   0x2   : > { %p162_p1 = scmp.lt.s32.totalorder %s3325_s15, 3 }
   0x4   : > { %p163_p2 = pnand %p2243_p0, %p162_p1 }
   0x5   : > { %v3187_v0 = vld [vmem:[%s3992_s1] sm:$0xff] (!%p163_p2)   ;;  %v3327_v1 = vmov (!%p163_p2), 0.0   ;;  %v3188_v2 = vld [vmem:[%s3992_s1 + $0x8] sm:$0xff] (!%p163_p2)   ;;  %vm3328_vm0 = vmmov (!%p163_p2), 0   ;;  %p188_p3 = scmp.lt.s32.totalorder (!%p163_p2), %s2239_s16, 1  ;;  %vm199_vm1 = vcmask (!%p163_p2), 516096  }
   0x6   : > { %166 = sbr.rel (%p163_p2) target bundleno = 1698 (0x6a2), region = 36  ;;  %2783 = vmatprep.subr.bf16.mxu0 (!%p163_p2), %v3327_v1  ;;  %202 = vst [vmem:[#allocation3] sm:$0x1] (!%p163_p2), %v3327_v1  ;;  %203 = vst [vmem:[#allocation3 + $0x11] sm:$0x1] (!%p163_p2), %v3327_v1  ;;  %2839 = vmatprep.subr.bf16.mxu1 (!%p163_p2), %v3327_v1  ;;  %v3189_v3 = vld [vmem:[%s3992_s1 + $0x10] sm:$0xff] (!%p163_p2)  }
   0x7   : > { %204 = vst [vmem:[#allocation4] sm:$0x1] (!%p163_p2), %v3327_v1  ;;  %205 = vst [vmem:[#allocation4 + $0x11] sm:$0x1] (!%p163_p2), %v3327_v1  ;;  %2784 = vmatpush3.bf16.msra.mxu0 (!%p163_p2), %v3187_v0  ;;  %2791 = vmatprep.mubr.msk.bf16.mxu0 (!%p163_p2), %vm3328_vm0, %v3327_v1  ;;  %vm208_vm2 = vcmask (!%p163_p2), 523264   ;;  %v3190_v6 = vld [vmem:[%s3992_s1 + $0x18] sm:$0xff] (!%p163_p2)  }
   0x8   : > { %2785 = vmatprep.subr.bf16.mxu0 (!%p163_p2), %v3327_v1  ;;  %2855 = vmatprep.mubr.msk.bf16.mxu1 (!%p163_p2), %vm3328_vm0, %v3327_v1  ;;  %200 = vst.msk [vmem:[#allocation2] sm:$0x1] (!%p163_p2), %vm199_vm1, %v3327_v1  ;;  %201 = vst.msk [vmem:[#allocation2 + $0x11] sm:$0x1] (!%p163_p2), %vm199_vm1, %v3327_v1  ;;  %v3199_v7 = vld [vmem:[%s3993_s2 + $0x40] sm:$0xff] (!%p163_p2)   ;;  %v3201_v8 = vld [vmem:[%s3993_s2 + $0x48] sm:$0xff] (!%p163_p2)  }
   0x9   : > { %2840 = vmatpush3.bf16.msra.mxu1 (!%p163_p2), %v3199_v7  ;;  %v3191_v11 = vld [vmem:[%s3992_s1 + $0x20] sm:$0xff] (!%p163_p2)   ;;  %v3203_v13 = vld [vmem:[%s3993_s2 + $0x50] sm:$0xff] (!%p163_p2)   ;;  %v3192_v14 = vld [vmem:[%s3992_s1 + $0x28] sm:$0xff] (!%p163_p2)  }
   0xa   : > { %2841 = vmatprep.subr.bf16.mxu1 (!%p163_p2), %v3327_v1  ;;  %v3205_v15 = vld [vmem:[%s3993_s2 + $0x58] sm:$0xff] (!%p163_p2)   ;;  %v3193_v16 = vld [vmem:[%s3992_s1 + $0x30] sm:$0xff] (!%p163_p2)   ;;  %v3207_v17 = vld [vmem:[%s3993_s2 + $0x60] sm:$0xff] (!%p163_p2)  }
   0xb   : > { %2786 = vmatpush3.bf16.msra.mxu0 (!%p163_p2), %v3188_v2  ;;  %v3194_v18 = vld [vmem:[%s3992_s1 + $0x38] sm:$0xff] (!%p163_p2)   ;;  %v3195_v21 = vld [vmem:[%s3992_s1 + $0x40] sm:$0xff] (!%p163_p2)   ;;  %v3196_v23 = vld [vmem:[%s3992_s1 + $0x48] sm:$0xff] (!%p163_p2)  }
   0xc   : > { %2787 = vmatprep.subr.bf16.mxu0 (!%p163_p2), %v3327_v1  ;;  %v3197_v24 = vld [vmem:[%s3992_s1 + $0x50] sm:$0xff] (!%p163_p2)   ;;  %v3198_v25 = vld [vmem:[%s3992_s1 + $0x58] sm:$0xff] (!%p163_p2)   ;;  %v3200_v28 = vld [vmem:[%s3993_s2] sm:$0xff] (!%p163_p2)  }
   0xd   : > { %s3997_s16 = smov (!%p188_p3, %s2239_s16), 1  ;;  %2842 = vmatpush3.bf16.msra.mxu1 %v3201_v8  ;;  %v3202_v30 = vld [vmem:[%s3993_s2 + $0x8] sm:$0xff]   ;;  %v3204_v31 = vld [vmem:[%s3993_s2 + $0x10] sm:$0xff]   ;;  %v3206_v32 = vld [vmem:[%s3993_s2 + $0x18] sm:$0xff]  }
   0xe   : > { %s2631_s23 = sshll.u32 %s3997_s16, 4  ;;  %2843 = vmatprep.subr.bf16.mxu1 %v3327_v1  ;;  %v3209_v33 = vld [vmem:[%s3993_s2 + $0x68] sm:$0xff]   ;;  %v3211_v34 = vld [vmem:[%s3993_s2 + $0x70] sm:$0xff]   ;;  %v3208_v35 = vld [vmem:[%s3993_s2 + $0x20] sm:$0xff]  }
   0xf   : > { %s192_s26 = scalar_lea.vmem %s3991_s0, %s2631_s23  ;;  %2788 = vmatpush3.bf16.msra.mxu0 %v3189_v3  ;;  %v3213_v36 = vld [vmem:[%s3993_s2 + $0x78] sm:$0xff]   ;;  %v3210_v37 = vld [vmem:[%s3993_s2 + $0x28] sm:$0xff]   ;;  %v3212_v38 = vld [vmem:[%s3993_s2 + $0x30] sm:$0xff]   ;;  %s197_s22 = scalar_lea.vmem %s3995_s4, %s2631_s23 }
  0x10   : > { %v206_v4 = vld [vmem:[%s192_s26] sm:$0xff]  ;;  %v207_v5 = vld [vmem:[%s192_s26 + $0x8] sm:$0xff]  ;;  %2789 = vmatprep.subr.bf16.mxu0 %v3327_v1  ;;  %v3214_v39 = vld [vmem:[%s3993_s2 + $0x38] sm:$0xff]  }
  0x11   : > { %209 = vst.msk [vmem:[#allocation2 + $0x1] sm:$0xff] %vm208_vm2, %v206_v4  ;;  %210 = vst.msk [vmem:[#allocation2 + $0x9] sm:$0xff] %vm208_vm2, %v207_v5  ;;  %2844 = vmatpush3.bf16.msra.mxu1 %v3203_v13  ;;  %v2248_v40 = vld [vmem:[%s3994_s3] ss:$0 sm:$0xff]  ;;  %v3216_v49 = vld [vmem:[%s3993_s2 + $0x88] sm:$0xff]  }
  0x12   : > { %2845 = vmatprep.subr.bf16.mxu1 %v3327_v1  ;;  %v3215_v47 = vld [vmem:[%s3993_s2 + $0x80] sm:$0xff]   ;;  %v3217_v52 = vld [vmem:[%s3993_s2 + $0x90] sm:$0xff]   ;;  %v3218_v54 = vld [vmem:[%s3993_s2 + $0x98] sm:$0xff]  }
  0x13   : > { %2790 = vmatpush3.bf16.msra.mxu0 %v3190_v6  ;;  %v3219_v55 = vld [vmem:[%s3993_s2 + $0xa0] sm:$0xff]   ;;  %v3220_v56 = vld [vmem:[%s3993_s2 + $0xa8] sm:$0xff]   ;;  %v3221_v57 = vld [vmem:[%s3993_s2 + $0xb0] sm:$0xff]  }
  0x14   : > { %2795 = vmatprep.subr.bf16.mxu0 %v3327_v1  ;;  %v3222_v58 = vld [vmem:[%s3993_s2 + $0xb8] sm:$0xff]   ;;  %v3223_v62 = vld [vmem:[%s3993_s2 + $0xc0] sm:$0xff]   ;;  %v3224_v63 = vld [vmem:[%s3993_s2 + $0xc8] sm:$0xff]  }
  0x15   : > { %2846 = vmatpush3.bf16.msra.mxu1 %v3205_v15  ;;  %v3225_v0 = vld [vmem:[%s3993_s2 + $0xd0] sm:$0xff]   ;;  %v3226_v2 = vld [vmem:[%s3993_s2 + $0xd8] sm:$0xff]   ;;  %v3227_v3 = vld [vmem:[%s3993_s2 + $0xe0] sm:$0xff]  }
  0x16   : > { %2847 = vmatprep.subr.bf16.mxu1 %v3327_v1  ;;  %v3228_v4 = vld [vmem:[%s3993_s2 + $0xe8] sm:$0xff]   ;;  %v3229_v5 = vld [vmem:[%s3993_s2 + $0xf0] sm:$0xff]   ;;  %v3230_v6 = vld [vmem:[%s3993_s2 + $0xf8] sm:$0xff]  }
  0x17   : > { %v3247_v7 = vld [vmem:[%s3993_s2 + $0x180] sm:$0xff]   ;;  %v3248_v8 = vld [vmem:[%s3993_s2 + $0x188] sm:$0xff]  }
  0x18   : > { %v216_v9 = vld [vmem:[#allocation2] sm:$0xff]  ;;  %v217_v10 = vld [vmem:[#allocation2 + $0x8] sm:$0xff] }
  0x19   : > { %v218_v12 = vpack.c.bf16 %v217_v10, %v216_v9  ;;  %v297_v19 = vld [vmem:[#allocation2 + $0x1] sm:$0xff]  ;;  %v298_v20 = vld [vmem:[#allocation2 + $0x9] sm:$0xff]  ;;  %2848 = vmatpush3.bf16.msra.mxu1 %v3207_v17  ;;  %v3250_v10 = vld [vmem:[%s3993_s2 + $0x198] sm:$0xff]  }
  0x1a   : > { %v299_v22 = vpack.c.bf16 %v298_v20, %v297_v19  ;;  %2849 = vmatprep.subr.bf16.mxu1 %v3327_v1  ;;  %v379_v26 = vld [vmem:[#allocation2 + $0x2] sm:$0xff]  ;;  %v380_v27 = vld [vmem:[#allocation2 + $0xa] sm:$0xff]  ;;  %v2280_v15 = vld [vmem:[%s3994_s3 + $0x1] ss:$0 sm:$0xff] }
  0x1b   : > { %2792 = vmatmul.mubr.msk.bf16.vlgmr.msra.gmra.mrb[0].mxu0 %vm208_vm2, %v218_v12  ;;  %v381_v29 = vpack.c.bf16 %v380_v27, %v379_v26  ;;  %v3249_v9 = vld [vmem:[%s3993_s2 + $0x190] sm:$0xff]  }
  0x1c   : > { %2796 = vmatpush3.bf16.msra.mxu0 %v3191_v11  ;;  %2803 = vmatprep.mubr.msk.bf16.mxu0 %vm3328_vm0, %v3327_v1 }
  0x1d   : > { %2797 = vmatprep.subr.bf16.mxu0 %v3327_v1  ;;  %2850 = vmatpush3.bf16.msra.mxu1 %v3209_v33  ;;  %v3234_v33 = vld [vmem:[%s3993_s2 + $0x118] sm:$0xff]  }
  0x1e   : > { %2851 = vmatprep.subr.bf16.mxu1 %v3327_v1 }
  0x20   : > { %2798 = vmatpush3.bf16.msra.mxu0 %v3192_v14 }
  0x21   : > { %2799 = vmatprep.subr.bf16.mxu0 %v3327_v1  ;;  %2852 = vmatpush3.bf16.msra.mxu1 %v3211_v34  ;;  %v3235_v34 = vld [vmem:[%s3993_s2 + $0x120] sm:$0xff]  }
  0x22   : > { %2853 = vmatprep.subr.bf16.mxu1 %v3327_v1 }
  0x24   : > { %2800 = vmatpush3.bf16.msra.mxu0 %v3193_v16 }
  0x25   : > { %2801 = vmatprep.subr.bf16.mxu0 %v3327_v1  ;;  %2854 = vmatpush3.bf16.msra.mxu1 %v3213_v36  ;;  %v3237_v36 = vld [vmem:[%s3993_s2 + $0x130] sm:$0xff]  }
  0x26   : > { %2859 = vmatprep.subr.bf16.mxu1 %v3327_v1 }
  0x28   : > { %2802 = vmatpush3.bf16.msra.mxu0 %v3194_v18 }
  0x29   : > { %2807 = vmatprep.subr.bf16.mxu0 %v3327_v1 }
  0x2b   : > { %2804 = vmatmul.mubr.msk.bf16.vlgmr.msra.gmra.mrb[0].mxu0 %vm208_vm2, %v299_v22 }
  0x2c   : > { %2808 = vmatpush3.bf16.msra.mxu0 %v3195_v21  ;;  %2815 = vmatprep.mubr.msk.bf16.mxu0 %vm3328_vm0, %v3327_v1 }
  0x2d   : > { %2809 = vmatprep.subr.bf16.mxu0 %v3327_v1 }
  0x30   : > { %2810 = vmatpush3.bf16.msra.mxu0 %v3196_v23 }
  0x31   : > { %2811 = vmatprep.subr.bf16.mxu0 %v3327_v1 }
  0x34   : > { %2812 = vmatpush3.bf16.msra.mxu0 %v3197_v24 }
  0x35   : > { %2813 = vmatprep.subr.bf16.mxu0 %v3327_v1 }
  0x38   : > { %2814 = vmatpush3.bf16.msra.mxu0 %v3198_v25 }
  0x39   : > { %2819 = vmatprep.subr.bf16.mxu0 %v3327_v1 }
  0x3b   : > { %2816 = vmatmul.mubr.msk.bf16.vlgmr.msra.gmra.mrb[0].mxu0 %vm208_vm2, %v381_v29  ;;  %v3231_v29 = vld [vmem:[%s3993_s2 + $0x100] sm:$0xff]  }
  0x3c   : > { %2820 = vmatpush3.bf16.msra.mxu0 %v3200_v28  ;;  %2835 = vmatprep.mubr.msk.bf16.mxu0 %vm3328_vm0, %v3327_v1 }
  0x3d   : > { %2821 = vmatprep.subr.bf16.mxu0 %v3327_v1 }
  0x40   : > { %2822 = vmatpush3.bf16.msra.mxu0 %v3202_v30 }
  0x41   : > { %2823 = vmatprep.subr.bf16.mxu0 %v3327_v1 }
  0x44   : > { %2824 = vmatpush3.bf16.msra.mxu0 %v3204_v31  ;;  %v3232_v31 = vld [vmem:[%s3993_s2 + $0x108] sm:$0xff]  }
  0x45   : > { %2825 = vmatprep.subr.bf16.mxu0 %v3327_v1 }
  0x48   : > { %2826 = vmatpush3.bf16.msra.mxu0 %v3206_v32  ;;  %v3233_v32 = vld [vmem:[%s3993_s2 + $0x110] sm:$0xff]  }
  0x49   : > { %2827 = vmatprep.subr.bf16.mxu0 %v3327_v1 }
  0x4c   : > { %2828 = vmatpush3.bf16.msra.mxu0 %v3208_v35  ;;  %v3236_v35 = vld [vmem:[%s3993_s2 + $0x128] sm:$0xff]  }
  0x4d   : > { %2829 = vmatprep.subr.bf16.mxu0 %v3327_v1 }
  0x50   : > { %2830 = vmatpush3.bf16.msra.mxu0 %v3210_v37  ;;  %v3238_v37 = vld [vmem:[%s3993_s2 + $0x138] sm:$0xff]  }
  0x51   : > { %2831 = vmatprep.subr.bf16.mxu0 %v3327_v1 }
  0x54   : > { %2832 = vmatpush3.bf16.msra.mxu0 %v3212_v38  ;;  %v3239_v38 = vld [vmem:[%s3993_s2 + $0x140] sm:$0xff]  }
  0x55   : > { %2833 = vmatprep.subr.bf16.mxu0 %v3327_v1 }
  0x58   : > { %2834 = vmatpush3.bf16.msra.mxu0 %v3214_v39  ;;  %v3240_v39 = vld [vmem:[%s3993_s2 + $0x148] sm:$0xff]  }
  0x59   : > { %2879 = vmatprep.subr.bf16.mxu0 %v3327_v1 }
 0x10e   : > { %v452_v41 = vpop.f32.mrb[0].mxu0 }
 0x10f   : > { %v3508_v42 = vadd.f32 %v2248_v40, %v452_v41  ;;  %v2817_v43 = vpop.f32.mrb[1].mxu0  ;;  %v3242_v41 = vld [vmem:[%s3993_s2 + $0x158] sm:$0xff]  }
 0x110   : > { %v455_v44 = vpop.f32.mrb[2].mxu0  ;;  %v3243_v43 = vld [vmem:[%s3993_s2 + $0x160] sm:$0xff]  }
 0x111   : > { %461 = vst [vmem:[#allocation3 + $0x1] sm:$0xff] %v3508_v42  ;;  %v3511_v45 = vadd.f32 %v2248_v40, %v455_v44  ;;  %v2818_v46 = vpop.f32.mrb[3].mxu0  ;;  %v3241_v40 = vld [vmem:[%s3993_s2 + $0x150] sm:$0xff]   ;;  %v3244_v44 = vld [vmem:[%s3993_s2 + $0x168] sm:$0xff]  }
 0x112   : > { %v3245_v46 = vld [vmem:[%s3993_s2 + $0x170] sm:$0xff]  }
 0x113   : > { %462 = vst [vmem:[#allocation3 + $0x9] sm:$0xff] %v3511_v45  ;;  %v580_v48 = vpack.c.bf16 %v3511_v45, %v3508_v42 }
 0x115   : > { %2856 = vmatmul.mubr.bf16.vlgmr.msra.gmra.mrb[0].mxu1 %v580_v48 }
 0x116   : > { %2860 = vmatpush3.bf16.msra.mxu1 %v3215_v47  ;;  %2875 = vmatprep.mubr.msk.bf16.mxu1 %vm3328_vm0, %v3327_v1  ;;  %v3246_v47 = vld [vmem:[%s3993_s2 + $0x178] sm:$0xff]  }
 0x117   : > { %2861 = vmatprep.subr.bf16.mxu1 %v3327_v1 }
 0x118   : > { %v468_v50 = vld [vmem:[#allocation3] sm:$0xff] }
 0x11a   : > { %v469_v51 = vld [vmem:[#allocation3 + $0x8] sm:$0xff]  ;;  %2862 = vmatpush3.bf16.msra.mxu1 %v3216_v49 }
 0x11b   : > { %v470_v53 = vpack.c.bf16 %v469_v51, %v468_v50  ;;  %2863 = vmatprep.subr.bf16.mxu1 %v3327_v1  ;;  %v689_v59 = vld [vmem:[#allocation3 + $0x2] sm:$0xff]  ;;  %v690_v60 = vld [vmem:[#allocation3 + $0xa] sm:$0xff] }
 0x11c   : > { %v691_v61 = vpack.c.bf16 %v690_v60, %v689_v59  ;;  %v3251_v51 = vld [vmem:[%s3993_s2 + $0x1a0] sm:$0xff]  }
 0x11d   : > { %2836 = vmatmul.mubr.bf16.vlgmr.msra.gmra.mrb[4].mxu0 %v470_v53  ;;  %v3253_v53 = vld [vmem:[%s3993_s2 + $0x1b0] sm:$0xff]   ;;  %v2337_v59 = vld [vmem:[%s3994_s3 + $0x2] ss:$0 sm:$0xff] }
 0x11e   : > { %2864 = vmatpush3.bf16.msra.mxu1 %v3217_v52  ;;  %2895 = vmatprep.mubr.msk.bf16.mxu0 %vm3328_vm0, %v3327_v1  ;;  %v3252_v52 = vld [vmem:[%s3993_s2 + $0x1a8] sm:$0xff]  }
 0x11f   : > { %2865 = vmatprep.subr.bf16.mxu1 %v3327_v1  ;;  %2880 = vmatpush3.bf16.msra.mxu0 %v3223_v62 }
 0x120   : > { %2881 = vmatprep.subr.bf16.mxu0 %v3327_v1 }
 0x122   : > { %2866 = vmatpush3.bf16.msra.mxu1 %v3218_v54  ;;  %v3254_v54 = vld [vmem:[%s3993_s2 + $0x1b8] sm:$0xff]  }
 0x123   : > { %2867 = vmatprep.subr.bf16.mxu1 %v3327_v1  ;;  %2882 = vmatpush3.bf16.msra.mxu0 %v3224_v63 }
 0x124   : > { %2883 = vmatprep.subr.bf16.mxu0 %v3327_v1 }
 0x126   : > { %2868 = vmatpush3.bf16.msra.mxu1 %v3219_v55  ;;  %v3271_v55 = vld [vmem:[%s3993_s2 + $0x240] sm:$0xff]  }
 0x127   : > { %2869 = vmatprep.subr.bf16.mxu1 %v3327_v1  ;;  %2884 = vmatpush3.bf16.msra.mxu0 %v3225_v0 }
 0x128   : > { %2885 = vmatprep.subr.bf16.mxu0 %v3327_v1 }
 0x12a   : > { %2870 = vmatpush3.bf16.msra.mxu1 %v3220_v56  ;;  %v3272_v56 = vld [vmem:[%s3993_s2 + $0x248] sm:$0xff]  }
 0x12b   : > { %2871 = vmatprep.subr.bf16.mxu1 %v3327_v1  ;;  %2886 = vmatpush3.bf16.msra.mxu0 %v3226_v2 }
 0x12c   : > { %2887 = vmatprep.subr.bf16.mxu0 %v3327_v1 }
 0x12e   : > { %2872 = vmatpush3.bf16.msra.mxu1 %v3221_v57  ;;  %v3273_v57 = vld [vmem:[%s3993_s2 + $0x250] sm:$0xff]  }
 0x12f   : > { %2873 = vmatprep.subr.bf16.mxu1 %v3327_v1  ;;  %2888 = vmatpush3.bf16.msra.mxu0 %v3227_v3 }
 0x130   : > { %2889 = vmatprep.subr.bf16.mxu0 %v3327_v1 }
 0x132   : > { %2874 = vmatpush3.bf16.msra.mxu1 %v3222_v58  ;;  %v3274_v58 = vld [vmem:[%s3993_s2 + $0x258] sm:$0xff]  }
 0x133   : > { %2939 = vmatprep.subr.bf16.mxu1 %v3327_v1  ;;  %2890 = vmatpush3.bf16.msra.mxu0 %v3228_v4 }
 0x134   : > { %2891 = vmatprep.subr.bf16.mxu0 %v3327_v1 }
 0x135   : > { %2876 = vmatmul.mubr.bf16.vlgmr.msra.gmra.mrb[0].mxu1 %v691_v61 }
 0x136   : > { %2955 = vmatprep.mubr.msk.bf16.mxu1 %vm3328_vm0, %v3327_v1  ;;  %2940 = vmatpush3.bf16.msra.mxu1 %v3247_v7 }
 0x137   : > { %2892 = vmatpush3.bf16.msra.mxu0 %v3229_v5  ;;  %2941 = vmatprep.subr.bf16.mxu1 %v3327_v1 }
 0x138   : > { %2893 = vmatprep.subr.bf16.mxu0 %v3327_v1 }
 0x13a   : > { %2942 = vmatpush3.bf16.msra.mxu1 %v3248_v8  ;;  %v3255_v8 = vld [vmem:[%s3993_s2 + $0x1c0] sm:$0xff]  }
 0x13b   : > { %2894 = vmatpush3.bf16.msra.mxu0 %v3230_v6  ;;  %2943 = vmatprep.subr.bf16.mxu1 %v3327_v1 }
 0x13c   : > { %2899 = vmatprep.subr.bf16.mxu0 %v3327_v1 }
 0x13e   : > { %2944 = vmatpush3.bf16.msra.mxu1 %v3249_v9 }
 0x13f   : > { %2945 = vmatprep.subr.bf16.mxu1 %v3327_v1 }
 0x142   : > { %2946 = vmatpush3.bf16.msra.mxu1 %v3250_v10  ;;  %v3256_v10 = vld [vmem:[%s3993_s2 + $0x1c8] sm:$0xff]  }
 0x143   : > { %2947 = vmatprep.subr.bf16.mxu1 %v3327_v1 }
 0x146   : > { %2948 = vmatpush3.bf16.msra.mxu1 %v3251_v51 }
 0x147   : > { %2949 = vmatprep.subr.bf16.mxu1 %v3327_v1 }
 0x14a   : > { %2950 = vmatpush3.bf16.msra.mxu1 %v3252_v52  ;;  %v3280_v52 = vld [vmem:[%s3993_s2 + $0x288] sm:$0xff]  }
 0x14b   : > { %2951 = vmatprep.subr.bf16.mxu1 %v3327_v1 }
 0x14e   : > { %2952 = vmatpush3.bf16.msra.mxu1 %v3253_v53  ;;  %v3281_v53 = vld [vmem:[%s3993_s2 + $0x290] sm:$0xff]  }
 0x14f   : > { %2953 = vmatprep.subr.bf16.mxu1 %v3327_v1 }
 0x152   : > { %2954 = vmatpush3.bf16.msra.mxu1 %v3254_v54  ;;  %v3282_v54 = vld [vmem:[%s3993_s2 + $0x298] sm:$0xff]  }
 0x153   : > { %2959 = vmatprep.subr.bf16.mxu1 %v3327_v1 }
 0x1f0   : > { %v569_v11 = vpop.f32.mrb[4].mxu0 }
 0x1f1   : > { %v2837_v12 = vpop.f32.mrb[5].mxu0  ;;  %v576_v16 = vadd.f32 %v2280_v15, %v569_v11  ;;  %v3257_v11 = vld [vmem:[%s3993_s2 + $0x1d0] sm:$0xff]  }
 0x1f2   : > { %v572_v13 = vpop.f32.mrb[6].mxu0  ;;  %v3258_v12 = vld [vmem:[%s3993_s2 + $0x1d8] sm:$0xff]  }
 0x1f3   : > { %v2838_v14 = vpop.f32.mrb[7].mxu0  ;;  %v577_v18 = vadd.f32 %v2280_v15, %v572_v13  ;;  %v3259_v13 = vld [vmem:[%s3993_s2 + $0x1e0] sm:$0xff]   ;;  %v3261_v15 = vld [vmem:[%s3993_s2 + $0x1f0] sm:$0xff]  }
 0x1f4   : > { %v3260_v14 = vld [vmem:[%s3993_s2 + $0x1e8] sm:$0xff]  }
 0x208   : > { %v791_v17 = vpop.f32.mrb[0].mxu1 }
 0x209   : > { %v3122_v19 = vadd.f32 %v791_v17, %v576_v16  ;;  %v2877_v20 = vpop.f32.mrb[1].mxu1  ;;  %v3262_v16 = vld [vmem:[%s3993_s2 + $0x1f8] sm:$0xff]   ;;  %v3263_v17 = vld [vmem:[%s3993_s2 + $0x200] sm:$0xff]  }
 0x20a   : > { %v794_v21 = vpop.f32.mrb[2].mxu1  ;;  %v3266_v20 = vld [vmem:[%s3993_s2 + $0x218] sm:$0xff]  }
 0x20b   : > { %v800_v22 = vmax.f32 %v3122_v19, 0.0  ;;  %v3124_v23 = vadd.f32 %v794_v21, %v577_v18  ;;  %v2878_v24 = vpop.f32.mrb[3].mxu1  ;;  %v3264_v18 = vld [vmem:[%s3993_s2 + $0x208] sm:$0xff]   ;;  %v3265_v19 = vld [vmem:[%s3993_s2 + $0x210] sm:$0xff]   ;;  %v3267_v21 = vld [vmem:[%s3993_s2 + $0x220] sm:$0xff]  }
 0x20c   : > { %v3270_v24 = vld [vmem:[%s3993_s2 + $0x238] sm:$0xff]  }
 0x20d   : > { %802 = vst [vmem:[#allocation4 + $0x1] sm:$0xff] %v800_v22  ;;  %v801_v25 = vmax.f32 %v3124_v23, 0.0  ;;  %v3269_v23 = vld [vmem:[%s3993_s2 + $0x230] sm:$0xff]  }
 0x20f   : > { %803 = vst [vmem:[#allocation4 + $0x9] sm:$0xff] %v801_v25  ;;  %v922_v26 = vpack.c.bf16 %v801_v25, %v800_v22  ;;  %v3268_v22 = vld [vmem:[%s3993_s2 + $0x228] sm:$0xff]  }
 0x214   : > { %v809_v27 = vld [vmem:[#allocation4] sm:$0xff] }
 0x216   : > { %v810_v28 = vld [vmem:[#allocation4 + $0x8] sm:$0xff] }
 0x217   : > { %v811_v30 = vpack.c.bf16 %v810_v28, %v809_v27  ;;  %v1031_v48 = vld [vmem:[#allocation4 + $0x2] sm:$0xff]  ;;  %v1032_v49 = vld [vmem:[#allocation4 + $0xa] sm:$0xff] }
 0x218   : > { %v1033_v50 = vpack.c.bf16 %v1032_v49, %v1031_v48  ;;  %v3275_v28 = vld [vmem:[%s3993_s2 + $0x260] sm:$0xff]  }
 0x219   : > { %2896 = vmatmul.mubr.bf16.vlgmr.msra.gmra.mrb[8].mxu0 %v811_v30  ;;  %v3277_v30 = vld [vmem:[%s3993_s2 + $0x270] sm:$0xff]  }
 0x21a   : > { %2900 = vmatpush3.bf16.msra.mxu0 %v3231_v29  ;;  %2915 = vmatprep.mubr.msk.bf16.mxu0 %vm3328_vm0, %v3327_v1  ;;  %v3276_v29 = vld [vmem:[%s3993_s2 + $0x268] sm:$0xff]  }
 0x21b   : > { %2901 = vmatprep.subr.bf16.mxu0 %v3327_v1 }
 0x21e   : > { %2902 = vmatpush3.bf16.msra.mxu0 %v3232_v31  ;;  %v3278_v31 = vld [vmem:[%s3993_s2 + $0x278] sm:$0xff]  }
 0x21f   : > { %2903 = vmatprep.subr.bf16.mxu0 %v3327_v1 }
 0x222   : > { %2904 = vmatpush3.bf16.msra.mxu0 %v3233_v32  ;;  %v3295_v32 = vld [vmem:[%s3993_s2 + $0x300] sm:$0xff]  }
 0x223   : > { %2905 = vmatprep.subr.bf16.mxu0 %v3327_v1 }
 0x226   : > { %2906 = vmatpush3.bf16.msra.mxu0 %v3234_v33  ;;  %v3296_v33 = vld [vmem:[%s3993_s2 + $0x308] sm:$0xff]  }
 0x227   : > { %2907 = vmatprep.subr.bf16.mxu0 %v3327_v1 }
 0x22a   : > { %2908 = vmatpush3.bf16.msra.mxu0 %v3235_v34  ;;  %v3297_v34 = vld [vmem:[%s3993_s2 + $0x310] sm:$0xff]  }
 0x22b   : > { %2909 = vmatprep.subr.bf16.mxu0 %v3327_v1 }
 0x22e   : > { %2910 = vmatpush3.bf16.msra.mxu0 %v3236_v35  ;;  %v3298_v35 = vld [vmem:[%s3993_s2 + $0x318] sm:$0xff]  }
 0x22f   : > { %2911 = vmatprep.subr.bf16.mxu0 %v3327_v1 }
 0x232   : > { %2912 = vmatpush3.bf16.msra.mxu0 %v3237_v36  ;;  %v2410_v36 = vld [vmem:[%s3994_s3 + $0x3] ss:$0 sm:$0xff] }
 0x233   : > { %2913 = vmatprep.subr.bf16.mxu0 %v3327_v1 }
 0x236   : > { %2914 = vmatpush3.bf16.msra.mxu0 %v3238_v37 }
 0x237   : > { %2919 = vmatprep.subr.bf16.mxu0 %v3327_v1 }
 0x239   : > { %2916 = vmatmul.mubr.bf16.vlgmr.msra.gmra.mrb[8].mxu0 %v922_v26 }
 0x23a   : > { %2920 = vmatpush3.bf16.msra.mxu0 %v3239_v38  ;;  %2935 = vmatprep.mubr.msk.bf16.mxu0 %vm3328_vm0, %v3327_v1 }
 0x23b   : > { %2921 = vmatprep.subr.bf16.mxu0 %v3327_v1 }
 0x23e   : > { %2922 = vmatpush3.bf16.msra.mxu0 %v3240_v39 }
 0x23f   : > { %2923 = vmatprep.subr.bf16.mxu0 %v3327_v1 }
 0x242   : > { %2924 = vmatpush3.bf16.msra.mxu0 %v3241_v40 }
 0x243   : > { %2925 = vmatprep.subr.bf16.mxu0 %v3327_v1 }
 0x246   : > { %2926 = vmatpush3.bf16.msra.mxu0 %v3242_v41 }
 0x247   : > { %2927 = vmatprep.subr.bf16.mxu0 %v3327_v1 }
 0x24a   : > { %2928 = vmatpush3.bf16.msra.mxu0 %v3243_v43 }
 0x24b   : > { %2929 = vmatprep.subr.bf16.mxu0 %v3327_v1 }
 0x24e   : > { %2930 = vmatpush3.bf16.msra.mxu0 %v3244_v44 }
 0x24f   : > { %2931 = vmatprep.subr.bf16.mxu0 %v3327_v1 }
 0x252   : > { %2932 = vmatpush3.bf16.msra.mxu0 %v3245_v46 }
 0x253   : > { %2933 = vmatprep.subr.bf16.mxu0 %v3327_v1 }
 0x256   : > { %2934 = vmatpush3.bf16.msra.mxu0 %v3246_v47 }
 0x257   : > { %2999 = vmatprep.subr.bf16.mxu0 %v3327_v1 }
 0x259   : > { %2936 = vmatmul.mubr.bf16.vlgmr.msra.gmra.mrb[8].mxu0 %v1033_v50  ;;  %v3279_v50 = vld [vmem:[%s3993_s2 + $0x280] sm:$0xff]  }
 0x25a   : > { %3015 = vmatprep.mubr.msk.bf16.mxu0 %vm3328_vm0, %v3327_v1  ;;  %3000 = vmatpush3.bf16.msra.mxu0 %v3271_v55  ;;  %v3283_v55 = vld [vmem:[%s3993_s2 + $0x2a0] sm:$0xff]  }
 0x25b   : > { %3001 = vmatprep.subr.bf16.mxu0 %v3327_v1 }
 0x25e   : > { %3002 = vmatpush3.bf16.msra.mxu0 %v3272_v56  ;;  %v3284_v56 = vld [vmem:[%s3993_s2 + $0x2a8] sm:$0xff]  }
 0x25f   : > { %3003 = vmatprep.subr.bf16.mxu0 %v3327_v1 }
 0x262   : > { %3004 = vmatpush3.bf16.msra.mxu0 %v3273_v57  ;;  %v3285_v57 = vld [vmem:[%s3993_s2 + $0x2b0] sm:$0xff]  }
 0x263   : > { %3005 = vmatprep.subr.bf16.mxu0 %v3327_v1 }
 0x266   : > { %3006 = vmatpush3.bf16.msra.mxu0 %v3274_v58  ;;  %v3286_v58 = vld [vmem:[%s3993_s2 + $0x2b8] sm:$0xff]  }
 0x267   : > { %3007 = vmatprep.subr.bf16.mxu0 %v3327_v1 }
 0x26a   : > { %3008 = vmatpush3.bf16.msra.mxu0 %v3275_v28 }
 0x26b   : > { %3009 = vmatprep.subr.bf16.mxu0 %v3327_v1 }
 0x26e   : > { %3010 = vmatpush3.bf16.msra.mxu0 %v3276_v29  ;;  %v3303_v29 = vld [vmem:[%s3993_s2 + $0x340] sm:$0xff]  }
 0x26f   : > { %3011 = vmatprep.subr.bf16.mxu0 %v3327_v1 }
 0x272   : > { %3012 = vmatpush3.bf16.msra.mxu0 %v3277_v30 }
 0x273   : > { %3013 = vmatprep.subr.bf16.mxu0 %v3327_v1 }
 0x276   : > { %3014 = vmatpush3.bf16.msra.mxu0 %v3278_v31  ;;  %v3308_v31 = vld [vmem:[%s3993_s2 + $0x368] sm:$0xff]  }
 0x277   : > { %3019 = vmatprep.subr.bf16.mxu0 %v3327_v1 }
 0x32c   : > { %v1133_v60 = vpop.f32.mrb[8].mxu0 }
 0x32d   : > { %v3125_v61 = vadd.f32 %v2337_v59, %v1133_v60  ;;  %v2937_v62 = vpop.f32.mrb[9].mxu0  ;;  %v3288_v60 = vld [vmem:[%s3993_s2 + $0x2c8] sm:$0xff]  }
 0x32e   : > { %v1136_v63 = vpop.f32.mrb[10].mxu0  ;;  %v3290_v62 = vld [vmem:[%s3993_s2 + $0x2d8] sm:$0xff]  }
 0x32f   : > { %v3710_v0 = vmax.f32 %v3125_v61, 0.0  ;;  %v3126_v2 = vadd.f32 %v2337_v59, %v1136_v63  ;;  %v2938_v3 = vpop.f32.mrb[11].mxu0  ;;  %v3287_v59 = vld [vmem:[%s3993_s2 + $0x2c0] sm:$0xff]   ;;  %v3289_v61 = vld [vmem:[%s3993_s2 + $0x2d0] sm:$0xff]  }
 0x330   : > { %v3291_v63 = vld [vmem:[%s3993_s2 + $0x2e0] sm:$0xff]   ;;  %v3293_v3 = vld [vmem:[%s3993_s2 + $0x2f0] sm:$0xff]  }
 0x331   : > { %1144 = vst [vmem:[#allocation3 + $0x1] sm:$0xff] %v3710_v0  ;;  %v3713_v4 = vmax.f32 %v3126_v2, 0.0  ;;  %v3292_v2 = vld [vmem:[%s3993_s2 + $0x2e8] sm:$0xff]  }
 0x333   : > { %1145 = vst [vmem:[#allocation3 + $0x9] sm:$0xff] %v3713_v4  ;;  %v1264_v5 = vpack.c.bf16 %v3713_v4, %v3710_v0 }
 0x338   : > { %v1151_v6 = vld [vmem:[#allocation3] sm:$0xff] }
 0x33a   : > { %v1152_v7 = vld [vmem:[#allocation3 + $0x8] sm:$0xff] }
 0x33b   : > { %v1153_v9 = vpack.c.bf16 %v1152_v7, %v1151_v6  ;;  %v1373_v25 = vld [vmem:[#allocation3 + $0x2] sm:$0xff]  ;;  %v1374_v26 = vld [vmem:[#allocation3 + $0xa] sm:$0xff] }
 0x33c   : > { %v1375_v27 = vpack.c.bf16 %v1374_v26, %v1373_v25 }
 0x33d   : > { %2956 = vmatmul.mubr.bf16.vlgmr.msra.gmra.mrb[4].mxu1 %v1153_v9  ;;  %v3299_v9 = vld [vmem:[%s3993_s2 + $0x320] sm:$0xff]  }
 0x33e   : > { %2960 = vmatpush3.bf16.msra.mxu1 %v3255_v8  ;;  %2975 = vmatprep.mubr.msk.bf16.mxu1 %vm3328_vm0, %v3327_v1 }
 0x33f   : > { %2961 = vmatprep.subr.bf16.mxu1 %v3327_v1 }
 0x342   : > { %2962 = vmatpush3.bf16.msra.mxu1 %v3256_v10  ;;  %v3300_v10 = vld [vmem:[%s3993_s2 + $0x328] sm:$0xff]  }
 0x343   : > { %2963 = vmatprep.subr.bf16.mxu1 %v3327_v1 }
 0x346   : > { %2964 = vmatpush3.bf16.msra.mxu1 %v3257_v11  ;;  %v3301_v11 = vld [vmem:[%s3993_s2 + $0x330] sm:$0xff]  }
 0x347   : > { %2965 = vmatprep.subr.bf16.mxu1 %v3327_v1 }
 0x34a   : > { %2966 = vmatpush3.bf16.msra.mxu1 %v3258_v12  ;;  %v3302_v12 = vld [vmem:[%s3993_s2 + $0x338] sm:$0xff]  }
 0x34b   : > { %2967 = vmatprep.subr.bf16.mxu1 %v3327_v1 }
 0x34e   : > { %2968 = vmatpush3.bf16.msra.mxu1 %v3259_v13  ;;  %v2483_v13 = vld [vmem:[%s3994_s3 + $0x4] ss:$0 sm:$0xff] }
 0x34f   : > { %2969 = vmatprep.subr.bf16.mxu1 %v3327_v1 }
 0x352   : > { %2970 = vmatpush3.bf16.msra.mxu1 %v3260_v14 }
 0x353   : > { %2971 = vmatprep.subr.bf16.mxu1 %v3327_v1 }
 0x356   : > { %2972 = vmatpush3.bf16.msra.mxu1 %v3261_v15 }
 0x357   : > { %2973 = vmatprep.subr.bf16.mxu1 %v3327_v1 }
 0x35a   : > { %2974 = vmatpush3.bf16.msra.mxu1 %v3262_v16 }
 0x35b   : > { %2979 = vmatprep.subr.bf16.mxu1 %v3327_v1 }
 0x35d   : > { %2976 = vmatmul.mubr.bf16.vlgmr.msra.gmra.mrb[4].mxu1 %v1264_v5  ;;  %v3294_v5 = vld [vmem:[%s3993_s2 + $0x2f8] sm:$0xff]  }
 0x35e   : > { %2980 = vmatpush3.bf16.msra.mxu1 %v3263_v17  ;;  %2995 = vmatprep.mubr.msk.bf16.mxu1 %vm3328_vm0, %v3327_v1 }
 0x35f   : > { %2981 = vmatprep.subr.bf16.mxu1 %v3327_v1 }
 0x362   : > { %2982 = vmatpush3.bf16.msra.mxu1 %v3264_v18  ;;  %v1828_v18 = vadd.f32 %v3508_v42, %v3710_v0  ;;  %v3304_v42 = vld [vmem:[%s3993_s2 + $0x348] sm:$0xff]   ;;  %v3306_v0 = vld [vmem:[%s3993_s2 + $0x358] sm:$0xff]  }
 0x363   : > { %2983 = vmatprep.subr.bf16.mxu1 %v3327_v1 }
 0x366   : > { %2984 = vmatpush3.bf16.msra.mxu1 %v3265_v19 }
 0x367   : > { %2985 = vmatprep.subr.bf16.mxu1 %v3327_v1 }
 0x36a   : > { %2986 = vmatpush3.bf16.msra.mxu1 %v3266_v20 }
 0x36b   : > { %2987 = vmatprep.subr.bf16.mxu1 %v3327_v1 }
 0x36e   : > { %2988 = vmatpush3.bf16.msra.mxu1 %v3267_v21 }
 0x36f   : > { %2989 = vmatprep.subr.bf16.mxu1 %v3327_v1 }
 0x372   : > { %2990 = vmatpush3.bf16.msra.mxu1 %v3268_v22  ;;  %v1829_v22 = vadd.f32 %v3511_v45, %v3713_v4  ;;  %v3305_v45 = vld [vmem:[%s3993_s2 + $0x350] sm:$0xff]   ;;  %v3307_v4 = vld [vmem:[%s3993_s2 + $0x360] sm:$0xff]  }
 0x373   : > { %2991 = vmatprep.subr.bf16.mxu1 %v3327_v1 }
 0x376   : > { %2992 = vmatpush3.bf16.msra.mxu1 %v3269_v23 }
 0x377   : > { %2993 = vmatprep.subr.bf16.mxu1 %v3327_v1 }
 0x37a   : > { %2994 = vmatpush3.bf16.msra.mxu1 %v3270_v24 }
 0x37b   : > { %3059 = vmatprep.subr.bf16.mxu1 %v3327_v1 }
 0x37d   : > { %2996 = vmatmul.mubr.bf16.vlgmr.msra.gmra.mrb[4].mxu1 %v1375_v27 }
 0x37e   : > { %3075 = vmatprep.mubr.msk.bf16.mxu1 %vm3328_vm0, %v3327_v1  ;;  %3060 = vmatpush3.bf16.msra.mxu1 %v3295_v32  ;;  %v3309_v32 = vld [vmem:[%s3993_s2 + $0x370] sm:$0xff]  }
 0x37f   : > { %3061 = vmatprep.subr.bf16.mxu1 %v3327_v1 }
 0x382   : > { %3062 = vmatpush3.bf16.msra.mxu1 %v3296_v33  ;;  %v3310_v33 = vld [vmem:[%s3993_s2 + $0x378] sm:$0xff]  }
 0x383   : > { %3063 = vmatprep.subr.bf16.mxu1 %v3327_v1 }
 0x386   : > { %3064 = vmatpush3.bf16.msra.mxu1 %v3297_v34  ;;  %v3311_v34 = vld [vmem:[%s3993_s2 + $0x380] sm:$0xff]  }
 0x387   : > { %3065 = vmatprep.subr.bf16.mxu1 %v3327_v1 }
 0x38a   : > { %3066 = vmatpush3.bf16.msra.mxu1 %v3298_v35  ;;  %v3312_v35 = vld [vmem:[%s3993_s2 + $0x388] sm:$0xff]  }
 0x38b   : > { %3067 = vmatprep.subr.bf16.mxu1 %v3327_v1 }
 0x38e   : > { %3068 = vmatpush3.bf16.msra.mxu1 %v3299_v9 }
 0x38f   : > { %3069 = vmatprep.subr.bf16.mxu1 %v3327_v1 }
 0x392   : > { %3070 = vmatpush3.bf16.msra.mxu1 %v3300_v10 }
 0x393   : > { %3071 = vmatprep.subr.bf16.mxu1 %v3327_v1 }
 0x396   : > { %3072 = vmatpush3.bf16.msra.mxu1 %v3301_v11 }
 0x397   : > { %3073 = vmatprep.subr.bf16.mxu1 %v3327_v1 }
 0x39a   : > { %3074 = vmatpush3.bf16.msra.mxu1 %v3302_v12 }
 0x39b   : > { %3079 = vmatprep.subr.bf16.mxu1 %v3327_v1 }
 0x450   : > { %v1475_v37 = vpop.f32.mrb[4].mxu1 }
 0x451   : > { %v3127_v38 = vadd.f32 %v2410_v36, %v1475_v37  ;;  %v2997_v39 = vpop.f32.mrb[5].mxu1  ;;  %v3314_v37 = vld [vmem:[%s3993_s2 + $0x398] sm:$0xff]  }
 0x452   : > { %v1478_v40 = vpop.f32.mrb[6].mxu1  ;;  %v3316_v39 = vld [vmem:[%s3993_s2 + $0x3a8] sm:$0xff]  }
 0x453   : > { %v1484_v41 = vmax.f32 %v3127_v38, 0.0  ;;  %v3128_v43 = vadd.f32 %v2410_v36, %v1478_v40  ;;  %v2998_v44 = vpop.f32.mrb[7].mxu1  ;;  %v3313_v36 = vld [vmem:[%s3993_s2 + $0x390] sm:$0xff]   ;;  %v3315_v38 = vld [vmem:[%s3993_s2 + $0x3a0] sm:$0xff]  }
 0x454   : > { %v3317_v40 = vld [vmem:[%s3993_s2 + $0x3b0] sm:$0xff]  }
 0x455   : > { %1486 = vst [vmem:[#allocation4 + $0x1] sm:$0xff] %v1484_v41  ;;  %v1485_v46 = vmax.f32 %v3128_v43, 0.0 }
 0x457   : > { %1487 = vst [vmem:[#allocation4 + $0x9] sm:$0xff] %v1485_v46  ;;  %v1606_v47 = vpack.c.bf16 %v1485_v46, %v1484_v41  ;;  %v3318_v41 = vld [vmem:[%s3993_s2 + $0x3b8] sm:$0xff]  }
 0x45c   : > { %v1493_v48 = vld [vmem:[#allocation4] sm:$0xff] }
 0x45e   : > { %v1494_v49 = vld [vmem:[#allocation4 + $0x8] sm:$0xff] }
 0x45f   : > { %v1495_v51 = vpack.c.bf16 %v1494_v49, %v1493_v48  ;;  %v1715_v6 = vld [vmem:[#allocation4 + $0x2] sm:$0xff]  ;;  %v1716_v7 = vld [vmem:[#allocation4 + $0xa] sm:$0xff] }
 0x460   : > { %v1717_v8 = vpack.c.bf16 %v1716_v7, %v1715_v6 }
 0x461   : > { %3016 = vmatmul.mubr.bf16.vlgmr.msra.gmra.mrb[12].mxu0 %v1495_v51 }
 0x462   : > { %3020 = vmatpush3.bf16.msra.mxu0 %v3279_v50  ;;  %3035 = vmatprep.mubr.msk.bf16.mxu0 %vm3328_vm0, %v3327_v1 }
 0x463   : > { %3021 = vmatprep.subr.bf16.mxu0 %v3327_v1 }
 0x466   : > { %3022 = vmatpush3.bf16.msra.mxu0 %v3280_v52 }
 0x467   : > { %3023 = vmatprep.subr.bf16.mxu0 %v3327_v1 }
 0x46a   : > { %3024 = vmatpush3.bf16.msra.mxu0 %v3281_v53 }
 0x46b   : > { %3025 = vmatprep.subr.bf16.mxu0 %v3327_v1 }
 0x46e   : > { %3026 = vmatpush3.bf16.msra.mxu0 %v3282_v54 }
 0x46f   : > { %3027 = vmatprep.subr.bf16.mxu0 %v3327_v1 }
 0x472   : > { %3028 = vmatpush3.bf16.msra.mxu0 %v3283_v55 }
 0x473   : > { %3029 = vmatprep.subr.bf16.mxu0 %v3327_v1 }
 0x476   : > { %3030 = vmatpush3.bf16.msra.mxu0 %v3284_v56 }
 0x477   : > { %3031 = vmatprep.subr.bf16.mxu0 %v3327_v1 }
 0x47a   : > { %3032 = vmatpush3.bf16.msra.mxu0 %v3285_v57 }
 0x47b   : > { %3033 = vmatprep.subr.bf16.mxu0 %v3327_v1 }
 0x47e   : > { %3034 = vmatpush3.bf16.msra.mxu0 %v3286_v58 }
 0x47f   : > { %3039 = vmatprep.subr.bf16.mxu0 %v3327_v1 }
 0x481   : > { %3036 = vmatmul.mubr.bf16.vlgmr.msra.gmra.mrb[12].mxu0 %v1606_v47  ;;  %v2556_v47 = vld [vmem:[%s3994_s3 + $0x5] ss:$0 sm:$0xff] }
 0x482   : > { %3040 = vmatpush3.bf16.msra.mxu0 %v3287_v59  ;;  %3055 = vmatprep.mubr.msk.bf16.mxu0 %vm3328_vm0, %v3327_v1 }
 0x483   : > { %3041 = vmatprep.subr.bf16.mxu0 %v3327_v1 }
 0x486   : > { %3042 = vmatpush3.bf16.msra.mxu0 %v3288_v60 }
 0x487   : > { %3043 = vmatprep.subr.bf16.mxu0 %v3327_v1 }
 0x48a   : > { %3044 = vmatpush3.bf16.msra.mxu0 %v3289_v61 }
 0x48b   : > { %3045 = vmatprep.subr.bf16.mxu0 %v3327_v1 }
 0x48e   : > { %3046 = vmatpush3.bf16.msra.mxu0 %v3290_v62 }
 0x48f   : > { %3047 = vmatprep.subr.bf16.mxu0 %v3327_v1 }
 0x492   : > { %3048 = vmatpush3.bf16.msra.mxu0 %v3291_v63 }
 0x493   : > { %3049 = vmatprep.subr.bf16.mxu0 %v3327_v1 }
 0x496   : > { %3050 = vmatpush3.bf16.msra.mxu0 %v3292_v2 }
 0x497   : > { %3051 = vmatprep.subr.bf16.mxu0 %v3327_v1 }
 0x49a   : > { %3052 = vmatpush3.bf16.msra.mxu0 %v3293_v3 }
 0x49b   : > { %3053 = vmatprep.subr.bf16.mxu0 %v3327_v1 }
 0x49e   : > { %3054 = vmatpush3.bf16.msra.mxu0 %v3294_v5 }
 0x4a1   : > { %3056 = vmatmul.mubr.bf16.vlgmr.msra.gmra.mrb[12].mxu0 %v1717_v8 }
 0x574   : > { %v1817_v14 = vpop.f32.mrb[12].mxu0 }
 0x575   : > { %v3129_v15 = vadd.f32 %v2483_v13, %v1817_v14  ;;  %v3057_v16 = vpop.f32.mrb[13].mxu0 }
 0x576   : > { %v1820_v17 = vpop.f32.mrb[14].mxu0 }
 0x577   : > { %v1826_v19 = vmax.f32 %v3129_v15, 0.0  ;;  %v3130_v20 = vadd.f32 %v2483_v13, %v1820_v17  ;;  %v3058_v21 = vpop.f32.mrb[15].mxu0 }
 0x579   : > { %v1830_v23 = vadd.f32 %v1828_v18, %v1826_v19  ;;  %v1827_v24 = vmax.f32 %v3130_v20, 0.0 }
 0x57b   : > { %1832 = vst [vmem:[#allocation3 + $0x1] sm:$0xff] %v1830_v23  ;;  %v1831_v25 = vadd.f32 %v1829_v22, %v1827_v24 }
 0x57d   : > { %1833 = vst [vmem:[#allocation3 + $0x9] sm:$0xff] %v1831_v25  ;;  %v1952_v26 = vpack.c.bf16 %v1831_v25, %v1830_v23 }
 0x582   : > { %v1839_v27 = vld [vmem:[#allocation3] sm:$0xff] }
 0x584   : > { %v1840_v28 = vld [vmem:[#allocation3 + $0x8] sm:$0xff] }
 0x585   : > { %v1841_v30 = vpack.c.bf16 %v1840_v28, %v1839_v27  ;;  %v2061_v43 = vld [vmem:[#allocation3 + $0x2] sm:$0xff]  ;;  %v2062_v44 = vld [vmem:[#allocation3 + $0xa] sm:$0xff] }
 0x586   : > { %v2063_v46 = vpack.c.bf16 %v2062_v44, %v2061_v43 }
 0x587   : > { %3076 = vmatmul.mubr.bf16.vlgmr.msra.gmra.mrb[8].mxu1 %v1841_v30 }
 0x588   : > { %3080 = vmatpush3.bf16.msra.mxu1 %v3303_v29  ;;  %3095 = vmatprep.mubr.msk.bf16.mxu1 %vm3328_vm0, %v3327_v1 }
 0x589   : > { %3081 = vmatprep.subr.bf16.mxu1 %v3327_v1 }
 0x58c   : > { %3082 = vmatpush3.bf16.msra.mxu1 %v3304_v42 }
 0x58d   : > { %3083 = vmatprep.subr.bf16.mxu1 %v3327_v1 }
 0x590   : > { %3084 = vmatpush3.bf16.msra.mxu1 %v3305_v45 }
 0x591   : > { %3085 = vmatprep.subr.bf16.mxu1 %v3327_v1 }
 0x594   : > { %3086 = vmatpush3.bf16.msra.mxu1 %v3306_v0 }
 0x595   : > { %3087 = vmatprep.subr.bf16.mxu1 %v3327_v1 }
 0x598   : > { %3088 = vmatpush3.bf16.msra.mxu1 %v3307_v4 }
 0x599   : > { %3089 = vmatprep.subr.bf16.mxu1 %v3327_v1 }
 0x59c   : > { %3090 = vmatpush3.bf16.msra.mxu1 %v3308_v31 }
 0x59d   : > { %3091 = vmatprep.subr.bf16.mxu1 %v3327_v1 }
 0x5a0   : > { %3092 = vmatpush3.bf16.msra.mxu1 %v3309_v32 }
 0x5a1   : > { %3093 = vmatprep.subr.bf16.mxu1 %v3327_v1 }
 0x5a4   : > { %3094 = vmatpush3.bf16.msra.mxu1 %v3310_v33 }
 0x5a5   : > { %3099 = vmatprep.subr.bf16.mxu1 %v3327_v1 }
 0x5a7   : > { %3096 = vmatmul.mubr.bf16.vlgmr.msra.gmra.mrb[8].mxu1 %v1952_v26 }
 0x5a8   : > { %3100 = vmatpush3.bf16.msra.mxu1 %v3311_v34  ;;  %3115 = vmatprep.mubr.msk.bf16.mxu1 %vm3328_vm0, %v3327_v1 }
 0x5a9   : > { %3101 = vmatprep.subr.bf16.mxu1 %v3327_v1 }
 0x5ac   : > { %3102 = vmatpush3.bf16.msra.mxu1 %v3312_v35 }
 0x5ad   : > { %3103 = vmatprep.subr.bf16.mxu1 %v3327_v1 }
 0x5b0   : > { %3104 = vmatpush3.bf16.msra.mxu1 %v3313_v36 }
 0x5b1   : > { %3105 = vmatprep.subr.bf16.mxu1 %v3327_v1 }
 0x5b4   : > { %3106 = vmatpush3.bf16.msra.mxu1 %v3314_v37 }
 0x5b5   : > { %3107 = vmatprep.subr.bf16.mxu1 %v3327_v1 }
 0x5b8   : > { %3108 = vmatpush3.bf16.msra.mxu1 %v3315_v38 }
 0x5b9   : > { %3109 = vmatprep.subr.bf16.mxu1 %v3327_v1 }
 0x5bc   : > { %3110 = vmatpush3.bf16.msra.mxu1 %v3316_v39 }
 0x5bd   : > { %3111 = vmatprep.subr.bf16.mxu1 %v3327_v1 }
 0x5c0   : > { %3112 = vmatpush3.bf16.msra.mxu1 %v3317_v40 }
 0x5c1   : > { %3113 = vmatprep.subr.bf16.mxu1 %v3327_v1 }
 0x5c4   : > { %3114 = vmatpush3.bf16.msra.mxu1 %v3318_v41 }
 0x5c7   : > { %3116 = vmatmul.mubr.bf16.vlgmr.msra.gmra.mrb[8].mxu1 %v2063_v46 }
 0x69a   : > { %v2163_v48 = vpop.f32.mrb[8].mxu1 }
 0x69b   : > { %v3131_v49 = vadd.f32 %v2556_v47, %v2163_v48  ;;  %v3117_v50 = vpop.f32.mrb[9].mxu1 }
 0x69c   : > { %v2166_v51 = vpop.f32.mrb[10].mxu1 }
 0x69d   : > { %v2172_v52 = vmax.f32 %v3131_v49, 0.0  ;;  %v3132_v1 = vadd.f32 %v2556_v47, %v2166_v51  ;;  %v3118_v53 = vpop.f32.mrb[11].mxu1 }
 0x69f   : > { %2174 = vst [vmem:[%s197_s22] sm:$0xff] %v2172_v52  ;;  %v2173_v54 = vmax.f32 %v3132_v1, 0.0 }
 0x6a1   : > { %2175 = vst [vmem:[%s197_s22 + $0x8] sm:$0xff] %v2173_v54 }
 0x6a2 PF: > { %s14_s15 = sadd.s32 1, %s3325_s15  }
 0x6a3   : > { %p11_p4 = scmp.ge.s32.totalorder %s14_s15, 4  }
 0x6a5   :  { %13 = sbr.rel (!%p11_p4) target bundleno = 1 (0x1), region = 82 }

</bundles_post_ra>
